<compile_context>
chip_gen: v5e
topology: v5e:2x2
jax: 0.10.0
libtpu: 0.0.40
codegen_flags: <defaults>
</compile_context>

<pallas_src>
import functools
import numpy as np

import jax
import jax.numpy as jnp
from jax.experimental import pallas as pl
from jax.experimental.pallas import tpu as pltpu


def _rup(x, m):
    return ((x + m - 1) // m) * m


def _pick_tile():
    # 256-wide N tiles feed the 2x256x256 MXU on v6e/v7x; 128 on older chips.
    try:
        kind = jax.devices()[0].device_kind.lower()
    except Exception:
        return 128
    for tag in ("v2", "v3", "v4", "v5"):
        if tag in kind:
            return 128
    return 256


_BASE = _pick_tile()
TN_MAX = _BASE                              # output lane tile
TM_MAX = 512 if _BASE == 256 else _BASE     # bigger M tiles on v6e/v7x (mem-bound GEMMs)

GRU_BR = 512        # max GRU block rows
GRU_LANES = 128


# --------------------------------------------------------------------------------------
# Pallas kernels
# --------------------------------------------------------------------------------------
def _mm_bias_kernel(a_ref, b_ref, bias_ref, o_ref, *, act):
    # bf16 operands, f32 MXU accumulation, f32 bias + activation epilogue.
    acc = jnp.dot(a_ref[...], b_ref[...], preferred_element_type=jnp.float32)
    acc = acc + bias_ref[...]
    if act == "relu":
        acc = jnp.maximum(acc, 0.0)
    elif act == "sigmoid":
        acc = 1.0 / (1.0 + jnp.exp(-acc))
    o_ref[...] = acc


def matmul_prepacked(a, b_p, bias_p, n_true, act="none"):
    """a: (M, K) f32, b_p: (Kp, Np) pre-packed bf16 weights, bias_p: (1, Np) f32.

    Adaptive tiles: M tile shrinks to rup(M, 8) for the tiny 1/16 / 1/8 stage GEMMs and
    grows up to 512 on v6e/v7x for the large ones.  Returns (M, n_true) f32.
    """
    M, K = a.shape
    Kp, Np = b_p.shape
    tm = min(TM_MAX, _rup(max(M, 1), 8))
    tn = min(TN_MAX, Np)
    Mp = _rup(M, tm)
    a_p = jnp.pad(a, ((0, Mp - M), (0, Kp - K))).astype(jnp.bfloat16)
    out = pl.pallas_call(
        functools.partial(_mm_bias_kernel, act=act),
        out_shape=jax.ShapeDtypeStruct((Mp, Np), jnp.float32),
        grid=(Mp // tm, Np // tn),
        in_specs=[
            pl.BlockSpec((tm, Kp), lambda i, j: (i, 0)),
            pl.BlockSpec((Kp, tn), lambda i, j: (0, j)),
            pl.BlockSpec((1, tn), lambda i, j: (0, j)),
        ],
        out_specs=pl.BlockSpec((tm, tn), lambda i, j: (i, j)),
        compiler_params=pltpu.CompilerParams(
            dimension_semantics=("parallel", "parallel")),
    )(a_p, b_p, bias_p)
    return out[:M, :n_true]


def _corr9_kernel(f1_ref, w_ref, o_ref, *, offsets, inv_c):
    # f1_ref: (1, H, W, C), w_ref: (1, H+2*pady, W+2*padx, C), o_ref: (1, 9, H, W)
    f1 = f1_ref[0]
    wp = w_ref[0]
    H, W = f1.shape[0], f1.shape[1]
    for k, (dy, dx) in enumerate(offsets):          # 9 offsets, fully unrolled
        win = wp[dy:dy + H, dx:dx + W, :]
        # direct per-offset store: only one (H, W) plane live at a time, no 9-plane stack
        o_ref[0, k] = jnp.sum(f1 * win, axis=-1) * inv_c


def pallas_corr9(fmap1, warped, small_patch):
    """9-offset local correlation (mean over C): NHWC inputs -> (N, 9, H, W).

    The warped map is read once; the 9 shifted windows are produced in VMEM.
    """
    N, H, W, C = fmap1.shape
    psize = (3, 3) if small_patch else (1, 9)
    pady, padx = psize[0] // 2, psize[1] // 2
    offsets = tuple((dy, dx) for dy in range(psize[0]) for dx in range(psize[1]))
    wp = jnp.pad(warped, ((0, 0), (pady, pady), (padx, padx), (0, 0)), mode="edge")
    # TODO(synk): tile H with a halo (manual make_async_copy) and lane-dense (N,9,H*W)
    # stores for real resolutions on v7x (64 MiB VMEM) / second-TensorCore utilization;
    # whole-plane blocks are fine at these feature-map sizes.
    return pl.pallas_call(
        functools.partial(_corr9_kernel, offsets=offsets, inv_c=1.0 / C),
        out_shape=jax.ShapeDtypeStruct((N, 9, H, W), jnp.float32),
        grid=(N,),
        in_specs=[
            pl.BlockSpec((1, H, W, C), lambda n: (n, 0, 0, 0)),
            pl.BlockSpec((1, H + 2 * pady, W + 2 * padx, C), lambda n: (n, 0, 0, 0)),
        ],
        out_specs=pl.BlockSpec((1, 9, H, W), lambda n: (n, 0, 0, 0)),
        compiler_params=pltpu.CompilerParams(dimension_semantics=("parallel",)),
    )(fmap1, wp)


def _gru_update_kernel(z_ref, q_ref, h_ref, o_ref):
    # z is already sigmoided (fused into the z/r GEMM epilogue).
    z = z_ref[...]
    o_ref[...] = (1.0 - z) * h_ref[...] + z * jnp.tanh(q_ref[...])


def pallas_gru_update(z, q_pre, h):
    """h_new = (1 - z) * h + z * tanh(q_pre), tiled over rows of 128 lanes."""
    shape = h.shape
    total = int(np.prod(shape))
    rows = _rup(pl.cdiv(total, GRU_LANES), 8)   # pad only to one vreg row-group
    br = min(GRU_BR, rows)
    rows = _rup(rows, br)
    P = rows * GRU_LANES

    def prep(x):
        return jnp.pad(x.reshape(-1), (0, P - total)).reshape(rows, GRU_LANES)

    out = pl.pallas_call(
        _gru_update_kernel,
        out_shape=jax.ShapeDtypeStruct((rows, GRU_LANES), jnp.float32),
        grid=(rows // br,),
        in_specs=[pl.BlockSpec((br, GRU_LANES), lambda i: (i, 0))] * 3,
        out_specs=pl.BlockSpec((br, GRU_LANES), lambda i: (i, 0)),
        compiler_params=pltpu.CompilerParams(dimension_semantics=("parallel",)),
    )(prep(z), prep(q_pre), prep(h))
    return out.reshape(-1)[:total].reshape(shape)


# --------------------------------------------------------------------------------------
# Conv2d = NHWC im2col (fused under jit) + Pallas GEMM with pre-packed weights
# --------------------------------------------------------------------------------------
def _im2col_nhwc(x, kh, kw, stride, padding):
    N, H, W, C = x.shape
    ph, pw = padding
    if kh == 1 and kw == 1 and stride == 1 and ph == 0 and pw == 0:
        return x.reshape(N * H * W, C), N, H, W          # pure view, no im2col
    xp = jnp.pad(x, ((0, 0), (ph, ph), (pw, pw), (0, 0)))
    Ho = (H + 2 * ph - kh) // stride + 1
    Wo = (W + 2 * pw - kw) // stride + 1
    cols = [xp[:, i:i + stride * Ho:stride, j:j + stride * Wo:stride, :]
            for i in range(kh) for j in range(kw)]
    A = jnp.concatenate(cols, axis=-1).reshape(N * Ho * Wo, kh * kw * C)
    return A, N, Ho, Wo


def conv_gemm(x, site, kh, kw, *, stride=1, padding=(0, 0), splits, act="none"):
    """Conv(s) sharing an input / geometry as one GEMM against pre-packed weights."""
    if isinstance(padding, int):
        padding = (padding, padding)
    A, N, Ho, Wo = _im2col_nhwc(x, kh, kw, stride, padding)
    out = matmul_prepacked(A, site["B"], site["bias"], sum(splits), act=act)
    res, c0 = [], 0
    for c in splits:
        res.append(out[:, c0:c0 + c].reshape(N, Ho, Wo, c))
        c0 += c
    return res


def instance_norm(x, eps=1e-5):
    mean = x.mean(axis=(1, 2), keepdims=True)
    var = x.var(axis=(1, 2), keepdims=True)
    return (x - mean) / jnp.sqrt(var + eps)


def avg_pool(x, k):
    N, H, W, C = x.shape
    return x.reshape(N, H // k, k, W // k, k, C).mean(axis=(2, 4))


def interpolate_bilinear(x, out_h, out_w):
    """F.interpolate(mode='bilinear', align_corners=True) on NCHW."""
    N, C, H, W = x.shape
    sy = (H - 1) / (out_h - 1) if out_h > 1 else 0.0
    sx = (W - 1) / (out_w - 1) if out_w > 1 else 0.0
    ys = jnp.arange(out_h, dtype=jnp.float32) * sy
    xs = jnp.arange(out_w, dtype=jnp.float32) * sx
    y0 = jnp.floor(ys).astype(jnp.int32)
    x0 = jnp.floor(xs).astype(jnp.int32)
    y1 = jnp.minimum(y0 + 1, H - 1)
    x1 = jnp.minimum(x0 + 1, W - 1)
    wy = (ys - y0.astype(jnp.float32)).reshape(1, 1, out_h, 1)
    wx = (xs - x0.astype(jnp.float32)).reshape(1, 1, 1, out_w)
    a = x[:, :, y0, :][:, :, :, x0]
    b = x[:, :, y0, :][:, :, :, x1]
    c = x[:, :, y1, :][:, :, :, x0]
    d = x[:, :, y1, :][:, :, :, x1]
    return (1 - wy) * ((1 - wx) * a + wx * b) + wy * ((1 - wx) * c + wx * d)


def bilinear_warp(img, flow):
    """img: (N, H, W, C) NHWC; flow: (N, 2, H, W)."""
    # TODO(synk): bilinear grid_sample (data-dependent gather) kept in plain JAX.
    N, H, W, C = img.shape
    gy, gx = jnp.meshgrid(jnp.arange(H, dtype=jnp.float32),
                          jnp.arange(W, dtype=jnp.float32), indexing="ij")
    xs = gx[None] + flow[:, 0]
    ys = gy[None] + flow[:, 1]
    x0 = jnp.floor(xs)
    y0 = jnp.floor(ys)
    wx = (xs - x0)[..., None]
    wy = (ys - y0)[..., None]
    img_flat = img.reshape(N, H * W, C)

    def gather(yi, xi):
        valid = (xi >= 0) & (xi <= W - 1) & (yi >= 0) & (yi <= H - 1)
        xi_c = jnp.clip(xi, 0, W - 1).astype(jnp.int32)
        yi_c = jnp.clip(yi, 0, H - 1).astype(jnp.int32)
        idx = (yi_c * W + xi_c).reshape(N, H * W, 1)
        g = jnp.take_along_axis(img_flat, jnp.broadcast_to(idx, (N, H * W, C)), axis=1)
        return g.reshape(N, H, W, C) * valid[..., None].astype(img.dtype)

    v00 = gather(y0, x0)
    v01 = gather(y0, x0 + 1)
    v10 = gather(y0 + 1, x0)
    v11 = gather(y0 + 1, x0 + 1)
    return (1 - wy) * ((1 - wx) * v00 + wx * v01) + wy * ((1 - wx) * v10 + wx * v11)


# --------------------------------------------------------------------------------------
# Parameters (deterministic synthetic init) + one-time GEMM packing
# --------------------------------------------------------------------------------------
def conv_param(key, cout, cin, kh, kw):
    fan_in = cin * kh * kw
    w = jax.random.normal(key, (cout, cin, kh, kw), jnp.float32) / np.sqrt(fan_in)
    return {"w": w, "b": jnp.zeros((cout,), jnp.float32)}


def init_encoder(key):
    ks = jax.random.split(key, 5)
    return {
        "conv1": conv_param(ks[0], 64, 3, 7, 7),
        "res_conv1": conv_param(ks[1], 96, 64, 3, 3),
        "res_conv2": conv_param(ks[2], 96, 96, 3, 3),
        "res_down": conv_param(ks[3], 96, 64, 1, 1),
        "conv2": conv_param(ks[4], 256, 96, 1, 1),
    }


def init_update_block(key, cor_planes=9, mask_size=4):
    ks = jax.random.split(key, 15)
    return {
        "convc1": conv_param(ks[0], 256, cor_planes, 1, 1),
        "convc2": conv_param(ks[1], 192, 256, 3, 3),
        "convf1": conv_param(ks[2], 128, 2, 7, 7),
        "convf2": conv_param(ks[3], 64, 128, 3, 3),
        "conv": conv_param(ks[4], 126, 256, 3, 3),
        "convz1": conv_param(ks[5], 128, 384, 1, 5),
        "convr1": conv_param(ks[6], 128, 384, 1, 5),
        "convq1": conv_param(ks[7], 128, 384, 1, 5),
        "convz2": conv_param(ks[8], 128, 384, 5, 1),
        "convr2": conv_param(ks[9], 128, 384, 5, 1),
        "convq2": conv_param(ks[10], 128, 384, 5, 1),
        "fh1": conv_param(ks[11], 256, 128, 3, 3),
        "fh2": conv_param(ks[12], 2, 256, 3, 3),
        "mask1": conv_param(ks[13], 256, 128, 3, 3),
        "mask2": conv_param(ks[14], mask_size * mask_size * 9, 256, 1, 1),
    }


def _pack_gemm(plist):
    """Pack conv weights (Cout,Cin,kh,kw) -> lane-aligned (Kp, Np) bf16 GEMM operand.

    K ordering is (kh, kw, Cin), matching the NHWC im2col channel-concat order.
    Merged convs (z/r, fh1/mask1) are concatenated along N.  Done ONCE at init.
    """
    mats, biases = [], []
    for p in plist:
        cout = p["w"].shape[0]
        mats.append(p["w"].transpose(2, 3, 1, 0).reshape(-1, cout))
        biases.append(p["b"])
    B = jnp.concatenate(mats, axis=1)
    bias = jnp.concatenate(biases)
    K, N = B.shape
    Kp = _rup(K, 128)
    tn = min(TN_MAX, _rup(N, 128))
    Np = _rup(N, tn)
    return {
        "B": jnp.pad(B, ((0, Kp - K), (0, Np - N))).astype(jnp.bfloat16),
        "bias": jnp.pad(bias.reshape(1, N), ((0, 0), (0, Np - N))).astype(jnp.float32),
    }


def init_params(key):
    k_f, k_u = jax.random.split(key)
    raw_f = init_encoder(k_f)
    raw_u = init_update_block(k_u, cor_planes=9, mask_size=4)
    fnet = {name: _pack_gemm([raw_f[name]]) for name in raw_f}
    update = {
        "convc1": _pack_gemm([raw_u["convc1"]]),
        "convc2": _pack_gemm([raw_u["convc2"]]),
        "convf1": _pack_gemm([raw_u["convf1"]]),
        "convf2": _pack_gemm([raw_u["convf2"]]),
        "conv": _pack_gemm([raw_u["conv"]]),
        "zr1": _pack_gemm([raw_u["convz1"], raw_u["convr1"]]),
        "q1": _pack_gemm([raw_u["convq1"]]),
        "zr2": _pack_gemm([raw_u["convz2"], raw_u["convr2"]]),
        "q2": _pack_gemm([raw_u["convq2"]]),
        "head1": _pack_gemm([raw_u["fh1"], raw_u["mask1"]]),
        "fh2": _pack_gemm([raw_u["fh2"]]),
        "mask2": _pack_gemm([raw_u["mask2"]]),
    }
    return {"fnet": fnet, "update": update}


# --------------------------------------------------------------------------------------
# Module forwards (NHWC activations end-to-end)
# --------------------------------------------------------------------------------------
@jax.jit
def encoder_forward(p, img_nchw):
    x = (2.0 * (img_nchw / 255.0) - 1.0).transpose(0, 2, 3, 1)   # -> NHWC, once
    # relu is not fused into these GEMMs: instance norm sits in between.
    x = jax.nn.relu(instance_norm(
        conv_gemm(x, p["conv1"], 7, 7, stride=2, padding=(3, 3), splits=(64,))[0]))
    y = jax.nn.relu(instance_norm(
        conv_gemm(x, p["res_conv1"], 3, 3, stride=2, padding=(1, 1), splits=(96,))[0]))
    y = jax.nn.relu(instance_norm(
        conv_gemm(y, p["res_conv2"], 3, 3, stride=1, padding=(1, 1), splits=(96,))[0]))
    xd = instance_norm(
        conv_gemm(x, p["res_down"], 1, 1, stride=2, padding=(0, 0), splits=(96,))[0])
    x = jax.nn.relu(xd + y)
    return conv_gemm(x, p["conv2"], 1, 1, splits=(256,))[0]       # (N, H/4, W/4, 256)


def motion_encoder(p, flow_nhwc, corr_nhwc):
    cor = conv_gemm(corr_nhwc, p["convc1"], 1, 1, splits=(256,), act="relu")[0]
    cor = conv_gemm(cor, p["convc2"], 3, 3, padding=(1, 1), splits=(192,), act="relu")[0]
    flo = conv_gemm(flow_nhwc, p["convf1"], 7, 7, padding=(3, 3), splits=(128,), act="relu")[0]
    flo = conv_gemm(flo, p["convf2"], 3, 3, padding=(1, 1), splits=(64,), act="relu")[0]
    out = conv_gemm(jnp.concatenate([cor, flo], axis=-1), p["conv"], 3, 3,
                    padding=(1, 1), splits=(126,), act="relu")[0]
    return jnp.concatenate([out, flow_nhwc], axis=-1)             # 128 channels


def sep_conv_gru(p, h, x):
    # horizontal pass (1x5): z/r convs merged into one GEMM with FUSED sigmoid epilogue
    hx = jnp.concatenate([h, x], axis=-1)
    z, r = conv_gemm(hx, p["zr1"], 1, 5, padding=(0, 2), splits=(128, 128), act="sigmoid")
    q_pre = conv_gemm(jnp.concatenate([r * h, x], axis=-1), p["q1"], 1, 5,
                      padding=(0, 2), splits=(128,))[0]
    h = pallas_gru_update(z, q_pre, h)
    # vertical pass (5x1)
    hx = jnp.concatenate([h, x], axis=-1)
    z, r = conv_gemm(hx, p["zr2"], 5, 1, padding=(2, 0), splits=(128, 128), act="sigmoid")
    q_pre = conv_gemm(jnp.concatenate([r * h, x], axis=-1), p["q2"], 5, 1,
                      padding=(2, 0), splits=(128,))[0]
    h = pallas_gru_update(z, q_pre, h)
    return h


def update_block(p, net, inp, corr_nhwc, flow_nchw):
    flow_nhwc = flow_nchw.transpose(0, 2, 3, 1)
    motion = motion_encoder(p, flow_nhwc, corr_nhwc)
    x = jnp.concatenate([inp, motion], axis=-1)                   # 256 channels
    net = sep_conv_gru(p, net, x)
    # fh1 and mask1 share `net` and geometry -> merged GEMM with fused relu
    head, mhead = conv_gemm(net, p["head1"], 3, 3, padding=(1, 1),
                            splits=(256, 256), act="relu")
    delta = conv_gemm(head, p["fh2"], 3, 3, padding=(1, 1), splits=(2,))[0]
    mask = conv_gemm(mhead, p["mask2"], 1, 1, splits=(144,))[0]
    return net, 0.25 * mask.transpose(0, 3, 1, 2), delta.transpose(0, 3, 1, 2)


def upsample_flow(flow, mask, rate=4):
    """Convex-combination upsampling [H,W,2] -> [rate*H, rate*W, 2] (NCHW flow/mask)."""
    N, _, H, W = flow.shape
    mask = mask.reshape(N, 1, 9, rate, rate, H, W)
    mask = jax.nn.softmax(mask, axis=2)
    fp = jnp.pad(rate * flow, ((0, 0), (0, 0), (1, 1), (1, 1)))
    patches = jnp.stack(
        [fp[:, :, i:i + H, j:j + W] for i in range(3) for j in range(3)], axis=2
    )  # (N, 2, 9, H, W) -- matches F.unfold channel ordering
    up_flow = patches.reshape(N, 2, 9, 1, 1, H, W)
    up_flow = jnp.sum(mask * up_flow, axis=2)                      # (N, 2, rate, rate, H, W)
    up_flow = up_flow.transpose(0, 1, 4, 2, 5, 3)                  # (N, 2, H, rate, W, rate)
    return up_flow.reshape(N, 2, rate * H, rate * W)


@functools.partial(jax.jit, static_argnames=("small_patch",))
def iteration_step(up, fmap1, fmap2, net, inp, flow, *, small_patch):
    """One refinement iteration: warp + local corr + update block + convex upsample.

    Whole-body jit: all glue (im2col concat, pads, casts, small transposes) fuses.
    """
    warped = bilinear_warp(fmap2, flow)
    corr = pallas_corr9(fmap1, warped, small_patch)                # (N, 9, H, W)
    net, up_mask, delta = update_block(up, net, inp, corr.transpose(0, 2, 3, 1), flow)
    flow = flow + delta
    flow_up4 = upsample_flow(flow, up_mask, rate=4)
    return net, flow, flow_up4


def raft_forward(params, image1, image2, iters=10):
    fnet, up = params["fnet"], params["update"]
    fmap1 = encoder_forward(fnet, image1)                          # NHWC (N, H/4, W/4, 256)
    fmap2 = encoder_forward(fnet, image2)

    hdim = 128
    net = jnp.tanh(fmap1[..., :hdim])
    inp = jax.nn.relu(fmap1[..., hdim:])

    s_fmap1, s_fmap2 = avg_pool(fmap1, 2), avg_pool(fmap2, 2)
    s_net, s_inp = avg_pool(net, 2), avg_pool(inp, 2)
    ss_fmap1, ss_fmap2 = avg_pool(fmap1, 4), avg_pool(fmap2, 4)
    ss_net, ss_inp = avg_pool(net, 4), avg_pool(inp, 4)

    flow_predictions = []
    flow_up = None

    # ---- 1/16 (ss) stage, zero-init flow ----
    N, ssH, ssW, _ = ss_fmap1.shape
    ss_flow = jnp.zeros((N, 2, ssH, ssW), jnp.float32)
    flow4 = None
    for itr in range(iters):
        small_patch = (itr % 2 == 1)
        ss_net, ss_flow, flow4 = iteration_step(
            up, ss_fmap1, ss_fmap2, ss_net, ss_inp, ss_flow, small_patch=small_patch)
        flow_up = -4.0 * interpolate_bilinear(flow4, 4 * flow4.shape[2], 4 * flow4.shape[3])
        flow_predictions.append(flow_up)

    # ---- 1/8 (s) stage ----
    scale = s_fmap1.shape[1] / flow4.shape[2]
    s_flow = -scale * interpolate_bilinear(flow4, s_fmap1.shape[1], s_fmap1.shape[2])
    for itr in range(iters):
        small_patch = (itr % 2 == 1)
        s_net, s_flow, flow4 = iteration_step(
            up, s_fmap1, s_fmap2, s_net, s_inp, s_flow, small_patch=small_patch)
        flow_up = -2.0 * interpolate_bilinear(flow4, 2 * flow4.shape[2], 2 * flow4.shape[3])
        flow_predictions.append(flow_up)

    # ---- full (1/4) stage ----
    scale = fmap1.shape[1] / flow4.shape[2]
    flow = -scale * interpolate_bilinear(flow4, fmap1.shape[1], fmap1.shape[2])
    for itr in range(iters):
        small_patch = (itr % 2 == 1)
        net, flow, flow4 = iteration_step(
            up, fmap1, fmap2, net, inp, flow, small_patch=small_patch)
        flow_up = -flow4
        flow_predictions.append(flow_up)

    return flow_up, flow_predictions


# --------------------------------------------------------------------------------------
if __name__ == "__main__":
    key = jax.random.PRNGKey(0)
    k_p, k_im1, k_im2 = jax.random.split(key, 3)

    params = init_params(k_p)

    # small images: N=1, C=3, H=W=32 -> fmap 1/4 = 8x8, s = 4x4, ss = 2x2
    image1 = jax.random.uniform(k_im1, (1, 3, 32, 32), jnp.float32, 0.0, 255.0)
    image2 = jax.random.uniform(k_im2, (1, 3, 32, 32), jnp.float32, 0.0, 255.0)

    flow_up, preds = raft_forward(params, image1, image2, iters=2)
    flow_up = jax.block_until_ready(flow_up)

    assert flow_up.shape == (1, 2, 32, 32)
    assert np.all(np.isfinite(np.asarray(flow_up)))
    print("KERNEL_OK")
</pallas_src>

<mosaic_0001>
module attributes {stable_mosaic.version = 11 : i64} {
  func.func @_mm_bias_kernel(%arg0: i32, %arg1: i32, %arg2: memref<256x256xbf16, #tpu.memory_space<vmem>>, %arg3: memref<256x128xbf16, #tpu.memory_space<vmem>>, %arg4: memref<1x128xf32, #tpu.memory_space<vmem>>, %arg5: memref<256x128xf32, #tpu.memory_space<vmem>>) attributes {dimension_semantics = [#tpu.dimension_semantics<parallel>, #tpu.dimension_semantics<parallel>], iteration_bounds = array<i64: 1, 1>, scalar_prefetch = 0 : i64, scratch_operands = 0 : i64, tpu.core_type = #tpu.core_type<tc>, window_params = [{transform_indices = @transform_0, window_bounds = array<i64: 256, 256>}, {transform_indices = @transform_1, window_bounds = array<i64: 256, 128>}, {transform_indices = @transform_2, window_bounds = array<i64: 1, 128>}, {transform_indices = @transform_3, window_bounds = array<i64: 256, 128>}]} {
    %c0 = arith.constant 0 : index
    %c0_0 = arith.constant 0 : index
    %0 = vector.load %arg2[%c0, %c0_0] : memref<256x256xbf16, #tpu.memory_space<vmem>>, vector<256x256xbf16>
    %c0_1 = arith.constant 0 : index
    %c0_2 = arith.constant 0 : index
    %1 = vector.load %arg3[%c0_1, %c0_2] : memref<256x128xbf16, #tpu.memory_space<vmem>>, vector<256x128xbf16>
    %cst = arith.constant dense<0.000000e+00> : vector<256x128xf32>
    %2 = tpu.matmul %0, %1, %cst {dimension_numbers = #tpu.dot_dimension_numbers<[1], [0], [0], [1], [0, 0, 1, 1], [], []>} : vector<256x256xbf16>, vector<256x128xbf16>, vector<256x128xf32> -> vector<256x128xf32>
    %c0_3 = arith.constant 0 : index
    %c0_4 = arith.constant 0 : index
    %3 = vector.load %arg4[%c0_3, %c0_4] : memref<1x128xf32, #tpu.memory_space<vmem>>, vector<1x128xf32>
    %4 = vector.broadcast %3 : vector<1x128xf32> to vector<256x128xf32>
    %5 = arith.addf %2, %4 : vector<256x128xf32>
    %c0_5 = arith.constant 0 : index
    %c0_6 = arith.constant 0 : index
    %6 = vector.load %arg5[%c0_5, %c0_6] : memref<256x128xf32, #tpu.memory_space<vmem>>, vector<256x128xf32>
    tpu.vector_store %arg5[%c0_5, %c0_6], %5 {strides = array<i32>} : memref<256x128xf32, #tpu.memory_space<vmem>>, vector<256x128xf32>,
    return
  }
  func.func @transform_0(%arg0: i32, %arg1: i32) -> (i32, i32) {
    %c0_i32 = arith.constant 0 : i32
    %c0_i32_0 = arith.constant 0 : i32
    return %arg0, %c0_i32 : i32, i32
  }
  func.func @transform_1(%arg0: i32, %arg1: i32) -> (i32, i32) {
    %c0_i32 = arith.constant 0 : i32
    %c0_i32_0 = arith.constant 0 : i32
    return %c0_i32, %arg1 : i32, i32
  }
  func.func @transform_2(%arg0: i32, %arg1: i32) -> (i32, i32) {
    %c0_i32 = arith.constant 0 : i32
    %c0_i32_0 = arith.constant 0 : i32
    return %c0_i32, %arg1 : i32, i32
  }
  func.func @transform_3(%arg0: i32, %arg1: i32) -> (i32, i32) {
    %c0_i32 = arith.constant 0 : i32
    return %arg0, %arg1 : i32, i32
  }
}

module attributes {stable_mosaic.version = 11 : i64} {
  func.func @_mm_bias_kernel(%arg0: i32, %arg1: i32, %arg2: memref<64x128xbf16, #tpu.memory_space<vmem>>, %arg3: memref<128x128xbf16, #tpu.memory_space<vmem>>, %arg4: memref<1x128xf32, #tpu.memory_space<vmem>>, %arg5: memref<64x128xf32, #tpu.memory_space<vmem>>) attributes {dimension_semantics = [#tpu.dimension_semantics<parallel>, #tpu.dimension_semantics<parallel>], iteration_bounds = array<i64: 1, 1>, scalar_prefetch = 0 : i64, scratch_operands = 0 : i64, tpu.core_type = #tpu.core_type<tc>, window_params = [{transform_indices = @transform_0, window_bounds = array<i64: 64, 128>}, {transform_indices = @transform_1, window_bounds = array<i64: 128, 128>}, {transform_indices = @transform_2, window_bounds = array<i64: 1, 128>}, {transform_indices = @transform_3, window_bounds = array<i64: 64, 128>}]} {
    %c0 = arith.constant 0 : index
    %c0_0 = arith.constant 0 : index
    %0 = vector.load %arg2[%c0, %c0_0] : memref<64x128xbf16, #tpu.memory_space<vmem>>, vector<64x128xbf16>
    %c0_1 = arith.constant 0 : index
    %c0_2 = arith.constant 0 : index
    %1 = vector.load %arg3[%c0_1, %c0_2] : memref<128x128xbf16, #tpu.memory_space<vmem>>, vector<128x128xbf16>
    %cst = arith.constant dense<0.000000e+00> : vector<64x128xf32>
    %2 = tpu.matmul %0, %1, %cst {dimension_numbers = #tpu.dot_dimension_numbers<[1], [0], [0], [1], [0, 0, 1, 1], [], []>} : vector<64x128xbf16>, vector<128x128xbf16>, vector<64x128xf32> -> vector<64x128xf32>
    %c0_3 = arith.constant 0 : index
    %c0_4 = arith.constant 0 : index
    %3 = vector.load %arg4[%c0_3, %c0_4] : memref<1x128xf32, #tpu.memory_space<vmem>>, vector<1x128xf32>
    %4 = vector.broadcast %3 : vector<1x128xf32> to vector<64x128xf32>
    %5 = arith.addf %2, %4 : vector<64x128xf32>
    %c0_5 = arith.constant 0 : index
    %c0_6 = arith.constant 0 : index
    %6 = vector.load %arg5[%c0_5, %c0_6] : memref<64x128xf32, #tpu.memory_space<vmem>>, vector<64x128xf32>
    tpu.vector_store %arg5[%c0_5, %c0_6], %5 {strides = array<i32>} : memref<64x128xf32, #tpu.memory_space<vmem>>, vector<64x128xf32>,
    return
  }
  func.func @transform_0(%arg0: i32, %arg1: i32) -> (i32, i32) {
    %c0_i32 = arith.constant 0 : i32
    %c0_i32_0 = arith.constant 0 : i32
    return %arg0, %c0_i32 : i32, i32
  }
  func.func @transform_1(%arg0: i32, %arg1: i32) -> (i32, i32) {
    %c0_i32 = arith.constant 0 : i32
    %c0_i32_0 = arith.constant 0 : i32
    return %c0_i32, %arg1 : i32, i32
  }
  func.func @transform_2(%arg0: i32, %arg1: i32) -> (i32, i32) {
    %c0_i32 = arith.constant 0 : i32
    %c0_i32_0 = arith.constant 0 : i32
    return %c0_i32, %arg1 : i32, i32
  }
  func.func @transform_3(%arg0: i32, %arg1: i32) -> (i32, i32) {
    %c0_i32 = arith.constant 0 : i32
    return %arg0, %arg1 : i32, i32
  }
}

module attributes {stable_mosaic.version = 11 : i64} {
  func.func @_mm_bias_kernel(%arg0: i32, %arg1: i32, %arg2: memref<64x640xbf16, #tpu.memory_space<vmem>>, %arg3: memref<640x128xbf16, #tpu.memory_space<vmem>>, %arg4: memref<1x128xf32, #tpu.memory_space<vmem>>, %arg5: memref<64x128xf32, #tpu.memory_space<vmem>>) attributes {dimension_semantics = [#tpu.dimension_semantics<parallel>, #tpu.dimension_semantics<parallel>], iteration_bounds = array<i64: 1, 1>, scalar_prefetch = 0 : i64, scratch_operands = 0 : i64, tpu.core_type = #tpu.core_type<tc>, window_params = [{transform_indices = @transform_0, window_bounds = array<i64: 64, 640>}, {transform_indices = @transform_1, window_bounds = array<i64: 640, 128>}, {transform_indices = @transform_2, window_bounds = array<i64: 1, 128>}, {transform_indices = @transform_3, window_bounds = array<i64: 64, 128>}]} {
    %c0 = arith.constant 0 : index
    %c0_0 = arith.constant 0 : index
    %0 = vector.load %arg2[%c0, %c0_0] : memref<64x640xbf16, #tpu.memory_space<vmem>>, vector<64x640xbf16>
    %c0_1 = arith.constant 0 : index
    %c0_2 = arith.constant 0 : index
    %1 = vector.load %arg3[%c0_1, %c0_2] : memref<640x128xbf16, #tpu.memory_space<vmem>>, vector<640x128xbf16>
    %cst = arith.constant dense<0.000000e+00> : vector<64x128xf32>
    %2 = tpu.matmul %0, %1, %cst {dimension_numbers = #tpu.dot_dimension_numbers<[1], [0], [0], [1], [0, 0, 1, 1], [], []>} : vector<64x640xbf16>, vector<640x128xbf16>, vector<64x128xf32> -> vector<64x128xf32>
    %c0_3 = arith.constant 0 : index
    %c0_4 = arith.constant 0 : index
    %3 = vector.load %arg4[%c0_3, %c0_4] : memref<1x128xf32, #tpu.memory_space<vmem>>, vector<1x128xf32>
    %4 = vector.broadcast %3 : vector<1x128xf32> to vector<64x128xf32>
    %5 = arith.addf %2, %4 : vector<64x128xf32>
    %c0_5 = arith.constant 0 : index
    %c0_6 = arith.constant 0 : index
    %6 = vector.load %arg5[%c0_5, %c0_6] : memref<64x128xf32, #tpu.memory_space<vmem>>, vector<64x128xf32>
    tpu.vector_store %arg5[%c0_5, %c0_6], %5 {strides = array<i32>} : memref<64x128xf32, #tpu.memory_space<vmem>>, vector<64x128xf32>,
    return
  }
  func.func @transform_0(%arg0: i32, %arg1: i32) -> (i32, i32) {
    %c0_i32 = arith.constant 0 : i32
    %c0_i32_0 = arith.constant 0 : i32
    return %arg0, %c0_i32 : i32, i32
  }
  func.func @transform_1(%arg0: i32, %arg1: i32) -> (i32, i32) {
    %c0_i32 = arith.constant 0 : i32
    %c0_i32_0 = arith.constant 0 : i32
    return %c0_i32, %arg1 : i32, i32
  }
  func.func @transform_2(%arg0: i32, %arg1: i32) -> (i32, i32) {
    %c0_i32 = arith.constant 0 : i32
    %c0_i32_0 = arith.constant 0 : i32
    return %c0_i32, %arg1 : i32, i32
  }
  func.func @transform_3(%arg0: i32, %arg1: i32) -> (i32, i32) {
    %c0_i32 = arith.constant 0 : i32
    return %arg0, %arg1 : i32, i32
  }
}

module attributes {stable_mosaic.version = 11 : i64} {
  func.func @_mm_bias_kernel(%arg0: i32, %arg1: i32, %arg2: memref<64x896xbf16, #tpu.memory_space<vmem>>, %arg3: memref<896x128xbf16, #tpu.memory_space<vmem>>, %arg4: memref<1x128xf32, #tpu.memory_space<vmem>>, %arg5: memref<64x128xf32, #tpu.memory_space<vmem>>) attributes {dimension_semantics = [#tpu.dimension_semantics<parallel>, #tpu.dimension_semantics<parallel>], iteration_bounds = array<i64: 1, 1>, scalar_prefetch = 0 : i64, scratch_operands = 0 : i64, tpu.core_type = #tpu.core_type<tc>, window_params = [{transform_indices = @transform_0, window_bounds = array<i64: 64, 896>}, {transform_indices = @transform_1, window_bounds = array<i64: 896, 128>}, {transform_indices = @transform_2, window_bounds = array<i64: 1, 128>}, {transform_indices = @transform_3, window_bounds = array<i64: 64, 128>}]} {
    %c0 = arith.constant 0 : index
    %c0_0 = arith.constant 0 : index
    %0 = vector.load %arg2[%c0, %c0_0] : memref<64x896xbf16, #tpu.memory_space<vmem>>, vector<64x896xbf16>
    %c0_1 = arith.constant 0 : index
    %c0_2 = arith.constant 0 : index
    %1 = vector.load %arg3[%c0_1, %c0_2] : memref<896x128xbf16, #tpu.memory_space<vmem>>, vector<896x128xbf16>
    %cst = arith.constant dense<0.000000e+00> : vector<64x128xf32>
    %2 = tpu.matmul %0, %1, %cst {dimension_numbers = #tpu.dot_dimension_numbers<[1], [0], [0], [1], [0, 0, 1, 1], [], []>} : vector<64x896xbf16>, vector<896x128xbf16>, vector<64x128xf32> -> vector<64x128xf32>
    %c0_3 = arith.constant 0 : index
    %c0_4 = arith.constant 0 : index
    %3 = vector.load %arg4[%c0_3, %c0_4] : memref<1x128xf32, #tpu.memory_space<vmem>>, vector<1x128xf32>
    %4 = vector.broadcast %3 : vector<1x128xf32> to vector<64x128xf32>
    %5 = arith.addf %2, %4 : vector<64x128xf32>
    %c0_5 = arith.constant 0 : index
    %c0_6 = arith.constant 0 : index
    %6 = vector.load %arg5[%c0_5, %c0_6] : memref<64x128xf32, #tpu.memory_space<vmem>>, vector<64x128xf32>
    tpu.vector_store %arg5[%c0_5, %c0_6], %5 {strides = array<i32>} : memref<64x128xf32, #tpu.memory_space<vmem>>, vector<64x128xf32>,
    return
  }
  func.func @transform_0(%arg0: i32, %arg1: i32) -> (i32, i32) {
    %c0_i32 = arith.constant 0 : i32
    %c0_i32_0 = arith.constant 0 : i32
    return %arg0, %c0_i32 : i32, i32
  }
  func.func @transform_1(%arg0: i32, %arg1: i32) -> (i32, i32) {
    %c0_i32 = arith.constant 0 : i32
    %c0_i32_0 = arith.constant 0 : i32
    return %c0_i32, %arg1 : i32, i32
  }
  func.func @transform_2(%arg0: i32, %arg1: i32) -> (i32, i32) {
    %c0_i32 = arith.constant 0 : i32
    %c0_i32_0 = arith.constant 0 : i32
    return %c0_i32, %arg1 : i32, i32
  }
  func.func @transform_3(%arg0: i32, %arg1: i32) -> (i32, i32) {
    %c0_i32 = arith.constant 0 : i32
    return %arg0, %arg1 : i32, i32
  }
}

module attributes {stable_mosaic.version = 11 : i64} {
  func.func @_mm_bias_kernel(%arg0: i32, %arg1: i32, %arg2: memref<64x128xbf16, #tpu.memory_space<vmem>>, %arg3: memref<128x256xbf16, #tpu.memory_space<vmem>>, %arg4: memref<1x256xf32, #tpu.memory_space<vmem>>, %arg5: memref<64x256xf32, #tpu.memory_space<vmem>>) attributes {dimension_semantics = [#tpu.dimension_semantics<parallel>, #tpu.dimension_semantics<parallel>], iteration_bounds = array<i64: 1, 1>, scalar_prefetch = 0 : i64, scratch_operands = 0 : i64, tpu.core_type = #tpu.core_type<tc>, window_params = [{transform_indices = @transform_0, window_bounds = array<i64: 64, 128>}, {transform_indices = @transform_1, window_bounds = array<i64: 128, 256>}, {transform_indices = @transform_2, window_bounds = array<i64: 1, 256>}, {transform_indices = @transform_3, window_bounds = array<i64: 64, 256>}]} {
    %c0 = arith.constant 0 : index
    %c0_0 = arith.constant 0 : index
    %0 = vector.load %arg2[%c0, %c0_0] : memref<64x128xbf16, #tpu.memory_space<vmem>>, vector<64x128xbf16>
    %c0_1 = arith.constant 0 : index
    %c0_2 = arith.constant 0 : index
    %1 = vector.load %arg3[%c0_1, %c0_2] : memref<128x256xbf16, #tpu.memory_space<vmem>>, vector<128x256xbf16>
    %cst = arith.constant dense<0.000000e+00> : vector<64x256xf32>
    %2 = tpu.matmul %0, %1, %cst {dimension_numbers = #tpu.dot_dimension_numbers<[1], [0], [0], [1], [0, 0, 1, 1], [], []>} : vector<64x128xbf16>, vector<128x256xbf16>, vector<64x256xf32> -> vector<64x256xf32>
    %c0_3 = arith.constant 0 : index
    %c0_4 = arith.constant 0 : index
    %3 = vector.load %arg4[%c0_3, %c0_4] : memref<1x256xf32, #tpu.memory_space<vmem>>, vector<1x256xf32>
    %4 = vector.broadcast %3 : vector<1x256xf32> to vector<64x256xf32>
    %5 = arith.addf %2, %4 : vector<64x256xf32>
    %c0_5 = arith.constant 0 : index
    %c0_6 = arith.constant 0 : index
    %6 = vector.load %arg5[%c0_5, %c0_6] : memref<64x256xf32, #tpu.memory_space<vmem>>, vector<64x256xf32>
    tpu.vector_store %arg5[%c0_5, %c0_6], %5 {strides = array<i32>} : memref<64x256xf32, #tpu.memory_space<vmem>>, vector<64x256xf32>,
    return
  }
  func.func @transform_0(%arg0: i32, %arg1: i32) -> (i32, i32) {
    %c0_i32 = arith.constant 0 : i32
    %c0_i32_0 = arith.constant 0 : i32
    return %arg0, %c0_i32 : i32, i32
  }
  func.func @transform_1(%arg0: i32, %arg1: i32) -> (i32, i32) {
    %c0_i32 = arith.constant 0 : i32
    %c0_i32_0 = arith.constant 0 : i32
    return %c0_i32, %arg1 : i32, i32
  }
  func.func @transform_2(%arg0: i32, %arg1: i32) -> (i32, i32) {
    %c0_i32 = arith.constant 0 : i32
    %c0_i32_0 = arith.constant 0 : i32
    return %c0_i32, %arg1 : i32, i32
  }
  func.func @transform_3(%arg0: i32, %arg1: i32) -> (i32, i32) {
    %c0_i32 = arith.constant 0 : i32
    return %arg0, %arg1 : i32, i32
  }
}

</mosaic_0001>

<bundles_post_ra>
// kernel: encoder_forward.8
= control target key start
LH: loop header
LB: loop body
LE: loop exit
PB: predicated region body
PF: predicated region fallthrough
CT: control target
= control target key end

     0   :  { %s323_s1 = inlined_call_operand.vmem [shape: bf16[128,128], index: 1, kind: input, shape index: {}]   ;;  %s324_s2 = inlined_call_operand.vmem [shape: f32[1,128], index: 2, kind: input, shape index: {}]   ;;  %s325_s0 = inlined_call_operand.vmem [shape: bf16[64,128], index: 0, kind: input, shape index: {}]   ;;  %s326_s3 = inlined_call_operand.vmem [shape: f32[64,128], index: 3, kind: output, shape index: {}]  }
   0x1   :  { %v214_v0 = vld [vmem:[%s323_s1 + $0x38] sm:$0xff]  ;;  %v213_v1 = vld [vmem:[%s323_s1 + $0x30] sm:$0xff]  ;;  %v212_v2 = vld [vmem:[%s323_s1 + $0x28] sm:$0xff] }
   0x2   :  { %114 = vmatpush.bf16.msra.mxu0 %v214_v0  ;;  %215 = vmatpush.bf16.msra.mxu1 %v214_v0  ;;  %v211_v3 = vld [vmem:[%s323_s1 + $0x20] sm:$0xff]  ;;  %v210_v4 = vld [vmem:[%s323_s1 + $0x18] sm:$0xff]  ;;  %v209_v5 = vld [vmem:[%s323_s1 + $0x10] sm:$0xff] }
   0x3   :  { %216 = vmatpush.bf16.msra.mxu2 %v214_v0  ;;  %217 = vmatpush.bf16.msra.mxu3 %v214_v0  ;;  %v208_v6 = vld [vmem:[%s323_s1 + $0x8] sm:$0xff]  ;;  %v207_v7 = vld [vmem:[%s323_s1] sm:$0xff]  ;;  %v205_v10 = vld [vmem:[%s325_s0 + $0x10] sm:$0xff] }
   0x4   :  { %v203_v8 = vld [vmem:[%s325_s0] sm:$0xff]  ;;  %v204_v9 = vld [vmem:[%s325_s0 + $0x8] sm:$0xff]  ;;  %v206_v11 = vld [vmem:[%s325_s0 + $0x18] sm:$0xff] }
   0x5   :  { %v239_v12 = vld [vmem:[%s324_s2] ss:$0 sm:$0xff] }
   0x6   :  { %115 = vmatpush.bf16.msra.mxu0 %v213_v1  ;;  %218 = vmatpush.bf16.msra.mxu1 %v213_v1 }
   0x7   :  { %219 = vmatpush.bf16.msra.mxu2 %v213_v1  ;;  %220 = vmatpush.bf16.msra.mxu3 %v213_v1 }
   0xa   :  { %116 = vmatpush.bf16.msra.mxu0 %v212_v2  ;;  %221 = vmatpush.bf16.msra.mxu1 %v212_v2 }
   0xb   :  { %222 = vmatpush.bf16.msra.mxu2 %v212_v2  ;;  %223 = vmatpush.bf16.msra.mxu3 %v212_v2 }
   0xe   :  { %117 = vmatpush.bf16.msra.mxu0 %v211_v3  ;;  %224 = vmatpush.bf16.msra.mxu1 %v211_v3 }
   0xf   :  { %225 = vmatpush.bf16.msra.mxu2 %v211_v3  ;;  %226 = vmatpush.bf16.msra.mxu3 %v211_v3 }
  0x12   :  { %118 = vmatpush.bf16.msra.mxu0 %v210_v4  ;;  %227 = vmatpush.bf16.msra.mxu1 %v210_v4 }
  0x13   :  { %228 = vmatpush.bf16.msra.mxu2 %v210_v4  ;;  %229 = vmatpush.bf16.msra.mxu3 %v210_v4 }
  0x16   :  { %119 = vmatpush.bf16.msra.mxu0 %v209_v5  ;;  %230 = vmatpush.bf16.msra.mxu1 %v209_v5 }
  0x17   :  { %231 = vmatpush.bf16.msra.mxu2 %v209_v5  ;;  %232 = vmatpush.bf16.msra.mxu3 %v209_v5 }
  0x1a   :  { %120 = vmatpush.bf16.msra.mxu0 %v208_v6  ;;  %233 = vmatpush.bf16.msra.mxu1 %v208_v6 }
  0x1b   :  { %234 = vmatpush.bf16.msra.mxu2 %v208_v6  ;;  %235 = vmatpush.bf16.msra.mxu3 %v208_v6 }
  0x1e   :  { %121 = vmatpush.bf16.msra.mxu0 %v207_v7  ;;  %236 = vmatpush.bf16.msra.mxu1 %v207_v7 }
  0x1f   :  { %237 = vmatpush.bf16.msra.mxu2 %v207_v7  ;;  %238 = vmatpush.bf16.msra.mxu3 %v207_v7 }
  0x21   :  { %122 = vmatmul.bf16.vlgmr.msra.gmra.mxu0 %v203_v8  ;;  %127 = vmatmul.bf16.vlgmr.msra.gmra.mxu1 %v204_v9 }
  0x22   :  { %132 = vmatmul.bf16.vlgmr.msra.gmra.mxu2 %v205_v10  ;;  %137 = vmatmul.bf16.vlgmr.msra.gmra.mxu3 %v206_v11 }
  0x9e   :  { %v123_v13 = vpop.f32.mrf.mxu0  ;;  %v128_v14 = vpop.f32.mrf.mxu1 }
  0x9f   :  { %v124_v15 = vadd.f32 %v239_v12, %v123_v13  ;;  %v129_v16 = vadd.f32 %v239_v12, %v128_v14 }
  0xa1   :  { %143 = vst [vmem:[%s326_s3] sm:$0xff] %v124_v15 }
  0xa2   :  { %145 = vst [vmem:[%s326_s3 + $0x10] sm:$0xff] %v129_v16 }
  0xa5   :  { %v133_v17 = vpop.f32.mrf.mxu2  ;;  %v138_v18 = vpop.f32.mrf.mxu3 }
  0xa6   :  { %v134_v19 = vadd.f32 %v239_v12, %v133_v17  ;;  %v139_v20 = vadd.f32 %v239_v12, %v138_v18  ;;  %v125_v21 = vpop.f32.mrf.mxu0  ;;  %v130_v22 = vpop.f32.mrf.mxu1 }
  0xa7   :  { %v126_v23 = vadd.f32 %v239_v12, %v125_v21  ;;  %v131_v24 = vadd.f32 %v239_v12, %v130_v22 }
  0xa8   :  { %147 = vst [vmem:[%s326_s3 + $0x20] sm:$0xff] %v134_v19 }
  0xa9   :  { %149 = vst [vmem:[%s326_s3 + $0x30] sm:$0xff] %v139_v20 }
  0xaa   :  { %144 = vst [vmem:[%s326_s3 + $0x8] sm:$0xff] %v126_v23 }
  0xab   :  { %146 = vst [vmem:[%s326_s3 + $0x18] sm:$0xff] %v131_v24 }
  0xad   :  { %v135_v25 = vpop.f32.mrf.mxu2  ;;  %v140_v26 = vpop.f32.mrf.mxu3 }
  0xae   :  { %v136_v27 = vadd.f32 %v239_v12, %v135_v25  ;;  %v141_v28 = vadd.f32 %v239_v12, %v140_v26 }
  0xb0   :  { %148 = vst [vmem:[%s326_s3 + $0x28] sm:$0xff] %v136_v27 }
  0xb1   :  { %150 = vst [vmem:[%s326_s3 + $0x38] sm:$0xff] %v141_v28 }

// kernel: encoder_forward.5
= control target key start
LH: loop header
LB: loop body
LE: loop exit
PB: predicated region body
PF: predicated region fallthrough
CT: control target
= control target key end

     0   :  { %s1202_s1 = inlined_call_operand.vmem [shape: bf16[256,128], index: 1, kind: input, shape index: {}]   ;;  %s1203_s2 = inlined_call_operand.vmem [shape: f32[1,128], index: 2, kind: input, shape index: {}]   ;;  %s1204_s0 = inlined_call_operand.vmem [shape: bf16[256,256], index: 0, kind: input, shape index: {}]   ;;  %s1205_s3 = inlined_call_operand.vmem [shape: f32[256,128], index: 3, kind: output, shape index: {}]  }
   0x1   :  { %v783_v0 = vld [vmem:[%s1202_s1 + $0x38] sm:$0xff]  ;;  %v782_v2 = vld [vmem:[%s1202_s1 + $0x30] sm:$0xff]  ;;  %v781_v4 = vld [vmem:[%s1202_s1 + $0x28] sm:$0xff] }
   0x2   :  { %v791_v1 = vld [vmem:[%s1202_s1 + $0x78] sm:$0xff]  ;;  %338 = vmatpush.bf16.msra.mxu0 %v783_v0  ;;  %792 = vmatpush.bf16.msra.mxu2 %v783_v0  ;;  %v790_v3 = vld [vmem:[%s1202_s1 + $0x70] sm:$0xff]  ;;  %v789_v5 = vld [vmem:[%s1202_s1 + $0x68] sm:$0xff] }
   0x3   :  { %427 = vmatpush.bf16.msra.mxu1 %v791_v1  ;;  %800 = vmatpush.bf16.msra.mxu3 %v791_v1  ;;  %v780_v6 = vld [vmem:[%s1202_s1 + $0x20] sm:$0xff]  ;;  %v779_v8 = vld [vmem:[%s1202_s1 + $0x18] sm:$0xff]  ;;  %v778_v10 = vld [vmem:[%s1202_s1 + $0x10] sm:$0xff] }
   0x4   :  { %v788_v7 = vld [vmem:[%s1202_s1 + $0x60] sm:$0xff]  ;;  %v787_v9 = vld [vmem:[%s1202_s1 + $0x58] sm:$0xff]  ;;  %v786_v11 = vld [vmem:[%s1202_s1 + $0x50] sm:$0xff] }
   0x5   :  { %v777_v12 = vld [vmem:[%s1202_s1 + $0x8] sm:$0xff]  ;;  %v776_v14 = vld [vmem:[%s1202_s1] sm:$0xff]  ;;  %v562_v28 = vld [vmem:[%s1204_s0 + $0x10] sm:$0xf] }
   0x6   :  { %339 = vmatpush.bf16.msra.mxu0 %v782_v2  ;;  %793 = vmatpush.bf16.msra.mxu2 %v782_v2  ;;  %v785_v13 = vld [vmem:[%s1202_s1 + $0x48] sm:$0xff]  ;;  %v784_v15 = vld [vmem:[%s1202_s1 + $0x40] sm:$0xff]  ;;  %v747_v29 = vld [vmem:[%s1204_s0 + $0x14] sm:$0xf0] }
   0x7   :  { %428 = vmatpush.bf16.msra.mxu1 %v790_v3  ;;  %801 = vmatpush.bf16.msra.mxu3 %v790_v3  ;;  %v554_v16 = vld [vmem:[%s1204_s0] sm:$0xf]  ;;  %v745_v17 = vld [vmem:[%s1204_s0 + $0x4] sm:$0xf0]  ;;  %v744_v20 = vld [vmem:[%s1204_s0 + $0x4] sm:$0xf]  ;;  %v563_v36 = vor.u32 %v747_v29, %v562_v28 }
   0x8   :  { %v618_v18 = vld [vmem:[%s1204_s0 + $0x80] sm:$0xf]  ;;  %v761_v19 = vld [vmem:[%s1204_s0 + $0x84] sm:$0xf0]  ;;  %v556_v21 = vld [vmem:[%s1204_s0 + $0x8] sm:$0xf0]  ;;  %v555_v24 = vor.u32 %v745_v17, %v554_v16 }
   0x9   :  { %v760_v22 = vld [vmem:[%s1204_s0 + $0x84] sm:$0xf]  ;;  %v620_v23 = vld [vmem:[%s1204_s0 + $0x88] sm:$0xf0]  ;;  %v619_v25 = vor.u32 %v761_v19, %v618_v18  ;;  %v559_v26 = vor.u32 %v744_v20, %v556_v21  ;;  %v626_v30 = vld [vmem:[%s1204_s0 + $0x90] sm:$0xf] }
   0xa   :  { %340 = vmatpush.bf16.msra.mxu0 %v781_v4  ;;  %794 = vmatpush.bf16.msra.mxu2 %v781_v4  ;;  %v623_v27 = vor.u32 %v760_v22, %v620_v23  ;;  %v763_v31 = vld [vmem:[%s1204_s0 + $0x94] sm:$0xf0]  ;;  %v746_v32 = vld [vmem:[%s1204_s0 + $0x14] sm:$0xf]  ;;  %v564_v33 = vld [vmem:[%s1204_s0 + $0x18] sm:$0xf0] }
   0xb   :  { %429 = vmatpush.bf16.msra.mxu1 %v789_v5  ;;  %802 = vmatpush.bf16.msra.mxu3 %v789_v5  ;;  %v762_v34 = vld [vmem:[%s1204_s0 + $0x94] sm:$0xf]  ;;  %v628_v35 = vld [vmem:[%s1204_s0 + $0x98] sm:$0xf0]  ;;  %v627_v37 = vor.u32 %v763_v31, %v626_v30  ;;  %v567_v38 = vor.u32 %v746_v32, %v564_v33  ;;  %v570_v40 = vld [vmem:[%s1204_s0 + $0x20] sm:$0xf] }
   0xc   :  { %v631_v39 = vor.u32 %v762_v34, %v628_v35  ;;  %v749_v41 = vld [vmem:[%s1204_s0 + $0x24] sm:$0xf0]  ;;  %v634_v42 = vld [vmem:[%s1204_s0 + $0xa0] sm:$0xf]  ;;  %v748_v44 = vld [vmem:[%s1204_s0 + $0x24] sm:$0xf] }
   0xd   :  { %v765_v43 = vld [vmem:[%s1204_s0 + $0xa4] sm:$0xf0]  ;;  %v572_v45 = vld [vmem:[%s1204_s0 + $0x28] sm:$0xf0]  ;;  %v764_v46 = vld [vmem:[%s1204_s0 + $0xa4] sm:$0xf]  ;;  %v571_v48 = vor.u32 %v749_v41, %v570_v40 }
   0xe   :  { %341 = vmatpush.bf16.msra.mxu0 %v780_v6  ;;  %795 = vmatpush.bf16.msra.mxu2 %v780_v6  ;;  %v636_v47 = vld [vmem:[%s1204_s0 + $0xa8] sm:$0xf0]  ;;  %v635_v49 = vor.u32 %v765_v43, %v634_v42  ;;  %v575_v50 = vor.u32 %v748_v44, %v572_v45  ;;  %v578_v52 = vld [vmem:[%s1204_s0 + $0x30] sm:$0xf]  ;;  %v751_v53 = vld [vmem:[%s1204_s0 + $0x34] sm:$0xf0] }
   0xf   :  { %430 = vmatpush.bf16.msra.mxu1 %v788_v7  ;;  %803 = vmatpush.bf16.msra.mxu3 %v788_v7  ;;  %v639_v51 = vor.u32 %v764_v46, %v636_v47  ;;  %v642_v54 = vld [vmem:[%s1204_s0 + $0xb0] sm:$0xf]  ;;  %v767_v55 = vld [vmem:[%s1204_s0 + $0xb4] sm:$0xf0]  ;;  %v750_v56 = vld [vmem:[%s1204_s0 + $0x34] sm:$0xf]  ;;  %v579_v60 = vor.u32 %v751_v53, %v578_v52 }
  0x10   :  { %v580_v57 = vld [vmem:[%s1204_s0 + $0x38] sm:$0xf0]  ;;  %v766_v58 = vld [vmem:[%s1204_s0 + $0xb4] sm:$0xf]  ;;  %v643_v61 = vor.u32 %v767_v55, %v642_v54  ;;  %v586_v0 = vld [vmem:[%s1204_s0 + $0x40] sm:$0xf] }
  0x11   :  { %v644_v59 = vld [vmem:[%s1204_s0 + $0xb8] sm:$0xf0]  ;;  %v583_v62 = vor.u32 %v750_v56, %v580_v57  ;;  %v753_v1 = vld [vmem:[%s1204_s0 + $0x44] sm:$0xf0]  ;;  %v650_v2 = vld [vmem:[%s1204_s0 + $0xc0] sm:$0xf] }
  0x12   :  { %342 = vmatpush.bf16.msra.mxu0 %v779_v8  ;;  %796 = vmatpush.bf16.msra.mxu2 %v779_v8  ;;  %v647_v63 = vor.u32 %v766_v58, %v644_v59  ;;  %v769_v3 = vld [vmem:[%s1204_s0 + $0xc4] sm:$0xf0]  ;;  %v752_v4 = vld [vmem:[%s1204_s0 + $0x44] sm:$0xf]  ;;  %v588_v5 = vld [vmem:[%s1204_s0 + $0x48] sm:$0xf0]  ;;  %v587_v8 = vor.u32 %v753_v1, %v586_v0 }
  0x13   :  { %431 = vmatpush.bf16.msra.mxu1 %v787_v9  ;;  %804 = vmatpush.bf16.msra.mxu3 %v787_v9  ;;  %v768_v6 = vld [vmem:[%s1204_s0 + $0xc4] sm:$0xf]  ;;  %v652_v7 = vld [vmem:[%s1204_s0 + $0xc8] sm:$0xf0]  ;;  %v651_v9 = vor.u32 %v769_v3, %v650_v2  ;;  %v754_v16 = vld [vmem:[%s1204_s0 + $0x54] sm:$0xf] }
  0x14   :  { %v596_v17 = vld [vmem:[%s1204_s0 + $0x58] sm:$0xf0]  ;;  %v770_v18 = vld [vmem:[%s1204_s0 + $0xd4] sm:$0xf]  ;;  %v756_v28 = vld [vmem:[%s1204_s0 + $0x64] sm:$0xf] }
  0x15   :  { %v660_v19 = vld [vmem:[%s1204_s0 + $0xd8] sm:$0xf0]  ;;  %v599_v22 = vor.u32 %v754_v16, %v596_v17  ;;  %v604_v29 = vld [vmem:[%s1204_s0 + $0x68] sm:$0xf0]  ;;  %v772_v30 = vld [vmem:[%s1204_s0 + $0xe4] sm:$0xf] }
  0x16   :  { %343 = vmatpush.bf16.msra.mxu0 %v778_v10  ;;  %797 = vmatpush.bf16.msra.mxu2 %v778_v10  ;;  %v591_v10 = vor.u32 %v752_v4, %v588_v5  ;;  %v663_v23 = vor.u32 %v770_v18, %v660_v19  ;;  %v668_v31 = vld [vmem:[%s1204_s0 + $0xe8] sm:$0xf0]  ;;  %v607_v34 = vor.u32 %v756_v28, %v604_v29  ;;  %v758_v40 = vld [vmem:[%s1204_s0 + $0x74] sm:$0xf]  ;;  %v612_v41 = vld [vmem:[%s1204_s0 + $0x78] sm:$0xf0] }
  0x17   :  { %432 = vmatpush.bf16.msra.mxu1 %v786_v11  ;;  %805 = vmatpush.bf16.msra.mxu3 %v786_v11  ;;  %v655_v11 = vor.u32 %v768_v6, %v652_v7  ;;  %v671_v35 = vor.u32 %v772_v30, %v668_v31  ;;  %v774_v42 = vld [vmem:[%s1204_s0 + $0xf4] sm:$0xf]  ;;  %v676_v43 = vld [vmem:[%s1204_s0 + $0xf8] sm:$0xf0]  ;;  %v615_v46 = vor.u32 %v758_v40, %v612_v41 }
  0x18   :  { %v679_v47 = vor.u32 %v774_v42, %v676_v43 }
  0x1a   :  { %344 = vmatpush.bf16.msra.mxu0 %v777_v12  ;;  %798 = vmatpush.bf16.msra.mxu2 %v777_v12  ;;  %v594_v12 = vld [vmem:[%s1204_s0 + $0x50] sm:$0xf] }
  0x1b   :  { %433 = vmatpush.bf16.msra.mxu1 %v785_v13  ;;  %806 = vmatpush.bf16.msra.mxu3 %v785_v13  ;;  %v755_v13 = vld [vmem:[%s1204_s0 + $0x54] sm:$0xf0] }
  0x1c   :  { %v595_v20 = vor.u32 %v755_v13, %v594_v12 }
  0x1e   :  { %345 = vmatpush.bf16.msra.mxu0 %v776_v14  ;;  %799 = vmatpush.bf16.msra.mxu2 %v776_v14  ;;  %v658_v14 = vld [vmem:[%s1204_s0 + $0xd0] sm:$0xf] }
  0x1f   :  { %434 = vmatpush.bf16.msra.mxu1 %v784_v15  ;;  %807 = vmatpush.bf16.msra.mxu3 %v784_v15  ;;  %v771_v15 = vld [vmem:[%s1204_s0 + $0xd4] sm:$0xf0] }
  0x20   :  { %v659_v21 = vor.u32 %v771_v15, %v658_v14 }
  0x21   :  { %346 = vmatmul.bf16.vlgmr.msra.gmra.mxu0 %v555_v24  ;;  %386 = vmatmul.bf16.vlgmr.msra.gmra.mxu2 %v619_v25  ;;  %v602_v24 = vld [vmem:[%s1204_s0 + $0x60] sm:$0xf]  ;;  %v757_v25 = vld [vmem:[%s1204_s0 + $0x64] sm:$0xf0] }
  0x22   :  { %435 = vmatmul.bf16.vlgmr.msra.gmra.mxu1 %v559_v26  ;;  %475 = vmatmul.bf16.vlgmr.msra.gmra.mxu3 %v623_v27  ;;  %v666_v26 = vld [vmem:[%s1204_s0 + $0xe0] sm:$0xf]  ;;  %v773_v27 = vld [vmem:[%s1204_s0 + $0xe4] sm:$0xf0]  ;;  %v603_v32 = vor.u32 %v757_v25, %v602_v24 }
  0x23   :  { %v667_v33 = vor.u32 %v773_v27, %v666_v26 }
  0x31   :  { %351 = vmatmul.bf16.gmra.mxu0 %v563_v36  ;;  %391 = vmatmul.bf16.gmra.mxu2 %v627_v37  ;;  %v610_v36 = vld [vmem:[%s1204_s0 + $0x70] sm:$0xf]  ;;  %v759_v37 = vld [vmem:[%s1204_s0 + $0x74] sm:$0xf0] }
  0x32   :  { %440 = vmatmul.bf16.gmra.mxu1 %v567_v38  ;;  %480 = vmatmul.bf16.gmra.mxu3 %v631_v39  ;;  %v674_v38 = vld [vmem:[%s1204_s0 + $0xf0] sm:$0xf]  ;;  %v775_v39 = vld [vmem:[%s1204_s0 + $0xf4] sm:$0xf0]  ;;  %v611_v44 = vor.u32 %v759_v37, %v610_v36 }
  0x33   :  { %v675_v45 = vor.u32 %v775_v39, %v674_v38 }
  0x41   :  { %356 = vmatmul.bf16.gmra.mxu0 %v571_v48  ;;  %396 = vmatmul.bf16.gmra.mxu2 %v635_v49  ;;  %v1072_v48 = vld [vmem:[%s1203_s2] ss:$0 sm:$0xff] }
  0x42   :  { %445 = vmatmul.bf16.gmra.mxu1 %v575_v50  ;;  %485 = vmatmul.bf16.gmra.mxu3 %v639_v51 }
  0x51   :  { %361 = vmatmul.bf16.gmra.mxu0 %v579_v60  ;;  %401 = vmatmul.bf16.gmra.mxu2 %v643_v61 }
  0x52   :  { %450 = vmatmul.bf16.gmra.mxu1 %v583_v62  ;;  %490 = vmatmul.bf16.gmra.mxu3 %v647_v63 }
  0x61   :  { %366 = vmatmul.bf16.gmra.mxu0 %v587_v8  ;;  %406 = vmatmul.bf16.gmra.mxu2 %v651_v9 }
  0x62   :  { %455 = vmatmul.bf16.gmra.mxu1 %v591_v10  ;;  %495 = vmatmul.bf16.gmra.mxu3 %v655_v11 }
  0x71   :  { %371 = vmatmul.bf16.gmra.mxu0 %v595_v20  ;;  %411 = vmatmul.bf16.gmra.mxu2 %v659_v21 }
  0x72   :  { %460 = vmatmul.bf16.gmra.mxu1 %v599_v22  ;;  %500 = vmatmul.bf16.gmra.mxu3 %v663_v23 }
  0x81   :  { %376 = vmatmul.bf16.gmra.mxu0 %v603_v32  ;;  %416 = vmatmul.bf16.gmra.mxu2 %v667_v33 }
  0x82   :  { %465 = vmatmul.bf16.gmra.mxu1 %v607_v34  ;;  %505 = vmatmul.bf16.gmra.mxu3 %v671_v35 }
  0x91   :  { %381 = vmatmul.bf16.gmra.mxu0 %v611_v44  ;;  %421 = vmatmul.bf16.gmra.mxu2 %v675_v45 }
  0x92   :  { %470 = vmatmul.bf16.gmra.mxu1 %v615_v46  ;;  %510 = vmatmul.bf16.gmra.mxu3 %v679_v47 }
  0x9e   :  { %v347_v49 = vpop.f32.mrf.mxu0 }
  0x9f   :  { %v348_v50 = vadd.f32 %v1072_v48, %v347_v49  ;;  %v436_v51 = vpop.f32.mrf.mxu1 }
  0xa1   :  { %v437_v52 = vadd.f32 %v436_v51, %v348_v50 }
  0xa3   :  { %516 = vst [vmem:[%s1205_s3] sm:$0xff] %v437_v52 }
  0xa4   :  { %v387_v53 = vpop.f32.mrf.mxu2 }
  0xa5   :  { %v388_v54 = vadd.f32 %v1072_v48, %v387_v53  ;;  %v476_v55 = vpop.f32.mrf.mxu3 }
  0xa6   :  { %v349_v56 = vpop.f32.mrf.mxu0 }
  0xa7   :  { %v477_v57 = vadd.f32 %v476_v55, %v388_v54  ;;  %v350_v58 = vadd.f32 %v1072_v48, %v349_v56  ;;  %v438_v59 = vpop.f32.mrf.mxu1 }
  0xa9   :  { %532 = vst [vmem:[%s1205_s3 + $0x80] sm:$0xff] %v477_v57  ;;  %v439_v60 = vadd.f32 %v438_v59, %v350_v58 }
  0xab   :  { %517 = vst [vmem:[%s1205_s3 + $0x8] sm:$0xff] %v439_v60 }
  0xac   :  { %v389_v61 = vpop.f32.mrf.mxu2 }
  0xad   :  { %v390_v62 = vadd.f32 %v1072_v48, %v389_v61  ;;  %v478_v63 = vpop.f32.mrf.mxu3 }
  0xae   :  { %v352_v0 = vpop.f32.mrf.mxu0 }
  0xaf   :  { %v479_v1 = vadd.f32 %v478_v63, %v390_v62  ;;  %v353_v2 = vadd.f32 %v1072_v48, %v352_v0  ;;  %v441_v3 = vpop.f32.mrf.mxu1 }
  0xb1   :  { %533 = vst [vmem:[%s1205_s3 + $0x88] sm:$0xff] %v479_v1  ;;  %v442_v4 = vadd.f32 %v441_v3, %v353_v2 }
  0xb3   :  { %518 = vst [vmem:[%s1205_s3 + $0x10] sm:$0xff] %v442_v4 }
  0xb4   :  { %v392_v5 = vpop.f32.mrf.mxu2 }
  0xb5   :  { %v393_v6 = vadd.f32 %v1072_v48, %v392_v5  ;;  %v481_v7 = vpop.f32.mrf.mxu3 }
  0xb6   :  { %v354_v8 = vpop.f32.mrf.mxu0 }
  0xb7   :  { %v482_v9 = vadd.f32 %v481_v7, %v393_v6  ;;  %v355_v10 = vadd.f32 %v1072_v48, %v354_v8  ;;  %v443_v11 = vpop.f32.mrf.mxu1 }
  0xb9   :  { %534 = vst [vmem:[%s1205_s3 + $0x90] sm:$0xff] %v482_v9  ;;  %v444_v12 = vadd.f32 %v443_v11, %v355_v10 }
  0xbb   :  { %519 = vst [vmem:[%s1205_s3 + $0x18] sm:$0xff] %v444_v12 }
  0xbc   :  { %v394_v13 = vpop.f32.mrf.mxu2 }
  0xbd   :  { %v395_v14 = vadd.f32 %v1072_v48, %v394_v13  ;;  %v483_v15 = vpop.f32.mrf.mxu3 }
  0xbe   :  { %v357_v16 = vpop.f32.mrf.mxu0 }
  0xbf   :  { %v484_v17 = vadd.f32 %v483_v15, %v395_v14  ;;  %v358_v18 = vadd.f32 %v1072_v48, %v357_v16  ;;  %v446_v19 = vpop.f32.mrf.mxu1 }
  0xc1   :  { %535 = vst [vmem:[%s1205_s3 + $0x98] sm:$0xff] %v484_v17  ;;  %v447_v20 = vadd.f32 %v446_v19, %v358_v18 }
  0xc3   :  { %520 = vst [vmem:[%s1205_s3 + $0x20] sm:$0xff] %v447_v20 }
  0xc4   :  { %v397_v21 = vpop.f32.mrf.mxu2 }
  0xc5   :  { %v398_v22 = vadd.f32 %v1072_v48, %v397_v21  ;;  %v486_v23 = vpop.f32.mrf.mxu3 }
  0xc6   :  { %v359_v24 = vpop.f32.mrf.mxu0 }
  0xc7   :  { %v487_v25 = vadd.f32 %v486_v23, %v398_v22  ;;  %v360_v26 = vadd.f32 %v1072_v48, %v359_v24  ;;  %v448_v27 = vpop.f32.mrf.mxu1 }
  0xc9   :  { %536 = vst [vmem:[%s1205_s3 + $0xa0] sm:$0xff] %v487_v25  ;;  %v449_v28 = vadd.f32 %v448_v27, %v360_v26 }
  0xcb   :  { %521 = vst [vmem:[%s1205_s3 + $0x28] sm:$0xff] %v449_v28 }
  0xcc   :  { %v399_v29 = vpop.f32.mrf.mxu2 }
  0xcd   :  { %v400_v30 = vadd.f32 %v1072_v48, %v399_v29  ;;  %v488_v31 = vpop.f32.mrf.mxu3 }
  0xce   :  { %v362_v32 = vpop.f32.mrf.mxu0 }
  0xcf   :  { %v489_v33 = vadd.f32 %v488_v31, %v400_v30  ;;  %v363_v34 = vadd.f32 %v1072_v48, %v362_v32  ;;  %v451_v35 = vpop.f32.mrf.mxu1 }
  0xd1   :  { %537 = vst [vmem:[%s1205_s3 + $0xa8] sm:$0xff] %v489_v33  ;;  %v452_v36 = vadd.f32 %v451_v35, %v363_v34 }
  0xd3   :  { %522 = vst [vmem:[%s1205_s3 + $0x30] sm:$0xff] %v452_v36 }
  0xd4   :  { %v402_v37 = vpop.f32.mrf.mxu2 }
  0xd5   :  { %v403_v38 = vadd.f32 %v1072_v48, %v402_v37  ;;  %v491_v39 = vpop.f32.mrf.mxu3 }
  0xd6   :  { %v364_v40 = vpop.f32.mrf.mxu0 }
  0xd7   :  { %v492_v41 = vadd.f32 %v491_v39, %v403_v38  ;;  %v365_v42 = vadd.f32 %v1072_v48, %v364_v40  ;;  %v453_v43 = vpop.f32.mrf.mxu1 }
  0xd9   :  { %538 = vst [vmem:[%s1205_s3 + $0xb0] sm:$0xff] %v492_v41  ;;  %v454_v44 = vadd.f32 %v453_v43, %v365_v42 }
  0xdb   :  { %523 = vst [vmem:[%s1205_s3 + $0x38] sm:$0xff] %v454_v44 }
  0xdc   :  { %v404_v45 = vpop.f32.mrf.mxu2 }
  0xdd   :  { %v405_v46 = vadd.f32 %v1072_v48, %v404_v45  ;;  %v493_v47 = vpop.f32.mrf.mxu3 }
  0xde   :  { %v367_v49 = vpop.f32.mrf.mxu0 }
  0xdf   :  { %v494_v50 = vadd.f32 %v493_v47, %v405_v46  ;;  %v368_v51 = vadd.f32 %v1072_v48, %v367_v49  ;;  %v456_v52 = vpop.f32.mrf.mxu1 }
  0xe1   :  { %539 = vst [vmem:[%s1205_s3 + $0xb8] sm:$0xff] %v494_v50  ;;  %v457_v53 = vadd.f32 %v456_v52, %v368_v51 }
  0xe3   :  { %524 = vst [vmem:[%s1205_s3 + $0x40] sm:$0xff] %v457_v53 }
  0xe4   :  { %v407_v54 = vpop.f32.mrf.mxu2 }
  0xe5   :  { %v408_v55 = vadd.f32 %v1072_v48, %v407_v54  ;;  %v496_v56 = vpop.f32.mrf.mxu3 }
  0xe6   :  { %v369_v57 = vpop.f32.mrf.mxu0 }
  0xe7   :  { %v497_v58 = vadd.f32 %v496_v56, %v408_v55  ;;  %v370_v59 = vadd.f32 %v1072_v48, %v369_v57  ;;  %v458_v60 = vpop.f32.mrf.mxu1 }
  0xe9   :  { %540 = vst [vmem:[%s1205_s3 + $0xc0] sm:$0xff] %v497_v58  ;;  %v459_v61 = vadd.f32 %v458_v60, %v370_v59 }
  0xeb   :  { %525 = vst [vmem:[%s1205_s3 + $0x48] sm:$0xff] %v459_v61 }
  0xec   :  { %v409_v62 = vpop.f32.mrf.mxu2 }
  0xed   :  { %v410_v63 = vadd.f32 %v1072_v48, %v409_v62  ;;  %v498_v0 = vpop.f32.mrf.mxu3 }
  0xee   :  { %v372_v1 = vpop.f32.mrf.mxu0 }
  0xef   :  { %v499_v2 = vadd.f32 %v498_v0, %v410_v63  ;;  %v373_v3 = vadd.f32 %v1072_v48, %v372_v1  ;;  %v461_v4 = vpop.f32.mrf.mxu1 }
  0xf1   :  { %541 = vst [vmem:[%s1205_s3 + $0xc8] sm:$0xff] %v499_v2  ;;  %v462_v5 = vadd.f32 %v461_v4, %v373_v3 }
  0xf3   :  { %526 = vst [vmem:[%s1205_s3 + $0x50] sm:$0xff] %v462_v5 }
  0xf4   :  { %v412_v6 = vpop.f32.mrf.mxu2 }
  0xf5   :  { %v413_v7 = vadd.f32 %v1072_v48, %v412_v6  ;;  %v501_v8 = vpop.f32.mrf.mxu3 }
  0xf6   :  { %v374_v9 = vpop.f32.mrf.mxu0 }
  0xf7   :  { %v502_v10 = vadd.f32 %v501_v8, %v413_v7  ;;  %v375_v11 = vadd.f32 %v1072_v48, %v374_v9  ;;  %v463_v12 = vpop.f32.mrf.mxu1 }
  0xf9   :  { %542 = vst [vmem:[%s1205_s3 + $0xd0] sm:$0xff] %v502_v10  ;;  %v464_v13 = vadd.f32 %v463_v12, %v375_v11 }
  0xfb   :  { %527 = vst [vmem:[%s1205_s3 + $0x58] sm:$0xff] %v464_v13 }
  0xfc   :  { %v414_v14 = vpop.f32.mrf.mxu2 }
  0xfd   :  { %v415_v15 = vadd.f32 %v1072_v48, %v414_v14  ;;  %v503_v16 = vpop.f32.mrf.mxu3 }
  0xfe   :  { %v377_v17 = vpop.f32.mrf.mxu0 }
  0xff   :  { %v504_v18 = vadd.f32 %v503_v16, %v415_v15  ;;  %v378_v19 = vadd.f32 %v1072_v48, %v377_v17  ;;  %v466_v20 = vpop.f32.mrf.mxu1 }
 0x101   :  { %543 = vst [vmem:[%s1205_s3 + $0xd8] sm:$0xff] %v504_v18  ;;  %v467_v21 = vadd.f32 %v466_v20, %v378_v19 }
 0x103   :  { %528 = vst [vmem:[%s1205_s3 + $0x60] sm:$0xff] %v467_v21 }
 0x104   :  { %v417_v22 = vpop.f32.mrf.mxu2 }
 0x105   :  { %v418_v23 = vadd.f32 %v1072_v48, %v417_v22  ;;  %v506_v24 = vpop.f32.mrf.mxu3 }
 0x106   :  { %v379_v25 = vpop.f32.mrf.mxu0 }
 0x107   :  { %v507_v26 = vadd.f32 %v506_v24, %v418_v23  ;;  %v380_v27 = vadd.f32 %v1072_v48, %v379_v25  ;;  %v468_v28 = vpop.f32.mrf.mxu1 }
 0x109   :  { %544 = vst [vmem:[%s1205_s3 + $0xe0] sm:$0xff] %v507_v26  ;;  %v469_v29 = vadd.f32 %v468_v28, %v380_v27 }
 0x10b   :  { %529 = vst [vmem:[%s1205_s3 + $0x68] sm:$0xff] %v469_v29 }
 0x10c   :  { %v419_v30 = vpop.f32.mrf.mxu2 }
 0x10d   :  { %v420_v31 = vadd.f32 %v1072_v48, %v419_v30  ;;  %v508_v32 = vpop.f32.mrf.mxu3 }
 0x10e   :  { %v382_v33 = vpop.f32.mrf.mxu0 }
 0x10f   :  { %v509_v34 = vadd.f32 %v508_v32, %v420_v31  ;;  %v383_v35 = vadd.f32 %v1072_v48, %v382_v33  ;;  %v471_v36 = vpop.f32.mrf.mxu1 }
 0x111   :  { %545 = vst [vmem:[%s1205_s3 + $0xe8] sm:$0xff] %v509_v34  ;;  %v472_v37 = vadd.f32 %v471_v36, %v383_v35 }
 0x113   :  { %530 = vst [vmem:[%s1205_s3 + $0x70] sm:$0xff] %v472_v37 }
 0x114   :  { %v422_v38 = vpop.f32.mrf.mxu2 }
 0x115   :  { %v423_v39 = vadd.f32 %v1072_v48, %v422_v38  ;;  %v511_v40 = vpop.f32.mrf.mxu3 }
 0x116   :  { %v384_v41 = vpop.f32.mrf.mxu0 }
 0x117   :  { %v512_v42 = vadd.f32 %v511_v40, %v423_v39  ;;  %v385_v43 = vadd.f32 %v1072_v48, %v384_v41  ;;  %v473_v44 = vpop.f32.mrf.mxu1 }
 0x119   :  { %546 = vst [vmem:[%s1205_s3 + $0xf0] sm:$0xff] %v512_v42  ;;  %v474_v45 = vadd.f32 %v473_v44, %v385_v43 }
 0x11b   :  { %531 = vst [vmem:[%s1205_s3 + $0x78] sm:$0xff] %v474_v45 }
 0x11c   :  { %v424_v46 = vpop.f32.mrf.mxu2 }
 0x11d   :  { %v425_v47 = vadd.f32 %v1072_v48, %v424_v46  ;;  %v513_v49 = vpop.f32.mrf.mxu3 }
 0x11f   :  { %v514_v50 = vadd.f32 %v513_v49, %v425_v47 }
 0x121   :  { %547 = vst [vmem:[%s1205_s3 + $0xf8] sm:$0xff] %v514_v50 }

// kernel: encoder_forward.6
= control target key start
LH: loop header
LB: loop body
LE: loop exit
PB: predicated region body
PF: predicated region fallthrough
CT: control target
= control target key end

     0   :  { %s1243_s1 = inlined_call_operand.vmem [shape: bf16[640,128], index: 1, kind: input, shape index: {}]   ;;  %s1244_s2 = inlined_call_operand.vmem [shape: f32[1,128], index: 2, kind: input, shape index: {}]   ;;  %s1245_s0 = inlined_call_operand.vmem [shape: bf16[64,640], index: 0, kind: input, shape index: {}]   ;;  %s1246_s3 = inlined_call_operand.vmem [shape: f32[64,128], index: 3, kind: output, shape index: {}]  }
   0x1   :  { %v890_v0 = vld [vmem:[%s1243_s1 + $0x38] sm:$0xff]  ;;  %v889_v2 = vld [vmem:[%s1243_s1 + $0x30] sm:$0xff]  ;;  %v888_v6 = vld [vmem:[%s1243_s1 + $0x28] sm:$0xff] }
   0x2   :  { %v906_v1 = vld [vmem:[%s1243_s1 + $0xb8] sm:$0xff]  ;;  %923 = vmatpush.bf16.msra.mxu1 %v890_v0  ;;  %466 = vmatpush.bf16.msra.mxu0 %v890_v0  ;;  %v905_v3 = vld [vmem:[%s1243_s1 + $0xb0] sm:$0xff]  ;;  %v904_v7 = vld [vmem:[%s1243_s1 + $0xa8] sm:$0xff] }
   0x3   :  { %524 = vmatpush.bf16.msra.mxu2 %v906_v1  ;;  %v914_v4 = vld [vmem:[%s1243_s1 + $0xf8] sm:$0xff]  ;;  %v913_v5 = vld [vmem:[%s1243_s1 + $0xf0] sm:$0xff]  ;;  %v912_v8 = vld [vmem:[%s1243_s1 + $0xe8] sm:$0xff] }
   0x4   :  { %553 = vmatpush.bf16.msra.mxu3 %v914_v4  ;;  %v887_v9 = vld [vmem:[%s1243_s1 + $0x20] sm:$0xff]  ;;  %v886_v12 = vld [vmem:[%s1243_s1 + $0x18] sm:$0xff]  ;;  %v885_v15 = vld [vmem:[%s1243_s1 + $0x10] sm:$0xff] }
   0x5   :  { %v903_v10 = vld [vmem:[%s1243_s1 + $0xa0] sm:$0xff]  ;;  %v902_v13 = vld [vmem:[%s1243_s1 + $0x98] sm:$0xff]  ;;  %v901_v16 = vld [vmem:[%s1243_s1 + $0x90] sm:$0xff] }
   0x6   :  { %924 = vmatpush.bf16.msra.mxu1 %v889_v2  ;;  %467 = vmatpush.bf16.msra.mxu0 %v889_v2  ;;  %v911_v11 = vld [vmem:[%s1243_s1 + $0xe0] sm:$0xff]  ;;  %v910_v14 = vld [vmem:[%s1243_s1 + $0xd8] sm:$0xff]  ;;  %v909_v17 = vld [vmem:[%s1243_s1 + $0xd0] sm:$0xff] }
   0x7   :  { %525 = vmatpush.bf16.msra.mxu2 %v905_v3  ;;  %v884_v18 = vld [vmem:[%s1243_s1 + $0x8] sm:$0xff]  ;;  %v883_v20 = vld [vmem:[%s1243_s1] sm:$0xff]  ;;  %v665_v21 = vld [vmem:[%s1245_s0 + $0x50] sm:$0xf] }
   0x8   :  { %554 = vmatpush.bf16.msra.mxu3 %v913_v5  ;;  %v900_v19 = vld [vmem:[%s1243_s1 + $0x88] sm:$0xff]  ;;  %v875_v22 = vld [vmem:[%s1245_s0 + $0x60] sm:$0xf0]  ;;  %v898_v24 = vld [vmem:[%s1243_s1 + $0x78] sm:$0xff] }
   0x9   :  { %v908_v23 = vld [vmem:[%s1243_s1 + $0xc8] sm:$0xff]  ;;  %v625_v25 = vld [vmem:[%s1245_s0] sm:$0xf]  ;;  %v865_v26 = vld [vmem:[%s1245_s0 + $0x10] sm:$0xf0]  ;;  %v666_v31 = vor.u32 %v875_v22, %v665_v21 }
   0xa   :  { %925 = vmatpush.bf16.msra.mxu1 %v888_v6  ;;  %468 = vmatpush.bf16.msra.mxu0 %v888_v6  ;;  %v899_v27 = vld [vmem:[%s1243_s1 + $0x80] sm:$0xff]  ;;  %v633_v28 = vld [vmem:[%s1245_s0 + $0x8] sm:$0xf]  ;;  %v866_v29 = vld [vmem:[%s1245_s0 + $0x18] sm:$0xf0]  ;;  %v626_v32 = vor.u32 %v865_v26, %v625_v25 }
   0xb   :  { %526 = vmatpush.bf16.msra.mxu2 %v904_v7  ;;  %v922_v30 = vld [vmem:[%s1243_s1 + $0x138] sm:$0xff]  ;;  %v634_v33 = vor.u32 %v866_v29, %v633_v28  ;;  %v907_v34 = vld [vmem:[%s1243_s1 + $0xc0] sm:$0xff]  ;;  %v864_v35 = vld [vmem:[%s1245_s0 + $0xc] sm:$0xf] }
   0xc   :  { %555 = vmatpush.bf16.msra.mxu3 %v912_v8  ;;  %v635_v36 = vld [vmem:[%s1245_s0 + $0x1c] sm:$0xf0]  ;;  %v897_v37 = vld [vmem:[%s1243_s1 + $0x70] sm:$0xff]  ;;  %v896_v40 = vld [vmem:[%s1243_s1 + $0x68] sm:$0xff] }
   0xd   :  { %v921_v38 = vld [vmem:[%s1243_s1 + $0x130] sm:$0xff]  ;;  %v638_v39 = vor.u32 %v864_v35, %v635_v36  ;;  %v920_v41 = vld [vmem:[%s1243_s1 + $0x128] sm:$0xff]  ;;  %v895_v42 = vld [vmem:[%s1243_s1 + $0x60] sm:$0xff] }
   0xe   :  { %926 = vmatpush.bf16.msra.mxu1 %v887_v9  ;;  %469 = vmatpush.bf16.msra.mxu0 %v887_v9  ;;  %v919_v43 = vld [vmem:[%s1243_s1 + $0x120] sm:$0xff]  ;;  %v685_v44 = vld [vmem:[%s1245_s0 + $0x78] sm:$0xf]  ;;  %v880_v45 = vld [vmem:[%s1245_s0 + $0x88] sm:$0xf0] }
   0xf   :  { %527 = vmatpush.bf16.msra.mxu2 %v903_v10  ;;  %v645_v46 = vld [vmem:[%s1245_s0 + $0x28] sm:$0xf]  ;;  %v870_v47 = vld [vmem:[%s1245_s0 + $0x38] sm:$0xf0]  ;;  %v653_v49 = vld [vmem:[%s1245_s0 + $0x30] sm:$0xf]  ;;  %v686_v52 = vor.u32 %v880_v45, %v685_v44 }
  0x10   :  { %556 = vmatpush.bf16.msra.mxu3 %v911_v11  ;;  %v894_v48 = vld [vmem:[%s1243_s1 + $0x58] sm:$0xff]  ;;  %v871_v50 = vld [vmem:[%s1245_s0 + $0x40] sm:$0xf0]  ;;  %v646_v53 = vor.u32 %v870_v47, %v645_v46  ;;  %v869_v55 = vld [vmem:[%s1245_s0 + $0x34] sm:$0xf] }
  0x11   :  { %v918_v51 = vld [vmem:[%s1243_s1 + $0x118] sm:$0xff]  ;;  %v654_v54 = vor.u32 %v871_v50, %v653_v49  ;;  %v655_v56 = vld [vmem:[%s1245_s0 + $0x44] sm:$0xf0]  ;;  %v893_v57 = vld [vmem:[%s1243_s1 + $0x50] sm:$0xff] }
  0x12   :  { %927 = vmatpush.bf16.msra.mxu1 %v886_v12  ;;  %470 = vmatpush.bf16.msra.mxu0 %v886_v12  ;;  %v917_v58 = vld [vmem:[%s1243_s1 + $0x110] sm:$0xff]  ;;  %v658_v59 = vor.u32 %v869_v55, %v655_v56  ;;  %v892_v60 = vld [vmem:[%s1243_s1 + $0x48] sm:$0xff]  ;;  %v891_v62 = vld [vmem:[%s1243_s1 + $0x40] sm:$0xff] }
  0x13   :  { %528 = vmatpush.bf16.msra.mxu2 %v902_v13  ;;  %v916_v61 = vld [vmem:[%s1243_s1 + $0x108] sm:$0xff]  ;;  %v915_v63 = vld [vmem:[%s1243_s1 + $0x100] sm:$0xff]  ;;  %v627_v1 = vld [vmem:[%s1245_s0 + $0x14] sm:$0xf0] }
  0x14   :  { %557 = vmatpush.bf16.msra.mxu3 %v910_v14  ;;  %v863_v0 = vld [vmem:[%s1245_s0 + $0x4] sm:$0xf]  ;;  %v641_v2 = vld [vmem:[%s1245_s0 + $0x10] sm:$0xf]  ;;  %v673_v4 = vld [vmem:[%s1245_s0 + $0x58] sm:$0xf] }
  0x15   :  { %v867_v3 = vld [vmem:[%s1245_s0 + $0x20] sm:$0xf0]  ;;  %v876_v5 = vld [vmem:[%s1245_s0 + $0x68] sm:$0xf0]  ;;  %v630_v6 = vor.u32 %v863_v0, %v627_v1  ;;  %v874_v9 = vld [vmem:[%s1245_s0 + $0x5c] sm:$0xf] }
  0x16   :  { %928 = vmatpush.bf16.msra.mxu1 %v885_v15  ;;  %471 = vmatpush.bf16.msra.mxu0 %v885_v15  ;;  %v642_v7 = vor.u32 %v867_v3, %v641_v2  ;;  %v674_v8 = vor.u32 %v876_v5, %v673_v4  ;;  %v675_v10 = vld [vmem:[%s1245_s0 + $0x6c] sm:$0xf0]  ;;  %v868_v12 = vld [vmem:[%s1245_s0 + $0x2c] sm:$0xf]  ;;  %v647_v13 = vld [vmem:[%s1245_s0 + $0x3c] sm:$0xf0] }
  0x17   :  { %529 = vmatpush.bf16.msra.mxu2 %v901_v16  ;;  %v678_v11 = vor.u32 %v874_v9, %v675_v10  ;;  %v661_v14 = vld [vmem:[%s1245_s0 + $0x38] sm:$0xf]  ;;  %v872_v15 = vld [vmem:[%s1245_s0 + $0x48] sm:$0xf0]  ;;  %v693_v16 = vld [vmem:[%s1245_s0 + $0x80] sm:$0xf] }
  0x18   :  { %558 = vmatpush.bf16.msra.mxu3 %v909_v17  ;;  %v881_v17 = vld [vmem:[%s1245_s0 + $0x90] sm:$0xf0]  ;;  %v879_v21 = vld [vmem:[%s1245_s0 + $0x84] sm:$0xf]  ;;  %v695_v22 = vld [vmem:[%s1245_s0 + $0x94] sm:$0xf0] }
  0x19   :  { %v667_v25 = vld [vmem:[%s1245_s0 + $0x64] sm:$0xf0]  ;;  %v681_v26 = vld [vmem:[%s1245_s0 + $0x60] sm:$0xf]  ;;  %v882_v29 = vld [vmem:[%s1245_s0 + $0x98] sm:$0xf0] }
  0x1a   :  { %929 = vmatpush.bf16.msra.mxu1 %v884_v18  ;;  %472 = vmatpush.bf16.msra.mxu0 %v884_v18  ;;  %v650_v18 = vor.u32 %v868_v12, %v647_v13  ;;  %v701_v28 = vld [vmem:[%s1245_s0 + $0x88] sm:$0xf] }
  0x1b   :  { %530 = vmatpush.bf16.msra.mxu2 %v900_v19  ;;  %v662_v19 = vor.u32 %v872_v15, %v661_v14 }
  0x1c   :  { %559 = vmatpush.bf16.msra.mxu3 %v908_v23  ;;  %v698_v23 = vor.u32 %v879_v21, %v695_v22 }
  0x1e   :  { %930 = vmatpush.bf16.msra.mxu1 %v883_v20  ;;  %473 = vmatpush.bf16.msra.mxu0 %v883_v20  ;;  %v694_v20 = vor.u32 %v881_v17, %v693_v16 }
  0x1f   :  { %531 = vmatpush.bf16.msra.mxu2 %v899_v27  ;;  %v877_v27 = vld [vmem:[%s1245_s0 + $0x70] sm:$0xf0] }
  0x20   :  { %560 = vmatpush.bf16.msra.mxu3 %v907_v34  ;;  %v687_v34 = vld [vmem:[%s1245_s0 + $0x8c] sm:$0xf0] }
  0x21   :  { %484 = vmatmul.bf16.vlgmr.msra.gmra.mxu1 %v666_v31  ;;  %474 = vmatmul.bf16.vlgmr.msra.gmra.mxu0 %v626_v32  ;;  %v682_v31 = vor.u32 %v877_v27, %v681_v26  ;;  %v702_v32 = vor.u32 %v882_v29, %v701_v28 }
  0x22   :  { %495 = vmatpush.bf16.msrb.mxu1 %v898_v24  ;;  %582 = vmatpush.bf16.msrb.mxu0 %v922_v30  ;;  %v873_v24 = vld [vmem:[%s1245_s0 + $0x54] sm:$0xf] }
  0x23   :  { %931 = vmatpush.bf16.msrb.mxu2 %v922_v30  ;;  %561 = vmatmul.bf16.vlgmr.msra.gmra.mxu3 %v638_v39  ;;  %v670_v30 = vor.u32 %v873_v24, %v667_v25 }
  0x24   :  { %532 = vmatmul.bf16.vlgmr.msra.gmra.mxu2 %v634_v33  ;;  %v878_v33 = vld [vmem:[%s1245_s0 + $0x7c] sm:$0xf] }
  0x25   :  { %v690_v35 = vor.u32 %v878_v33, %v687_v34 }
  0x26   :  { %496 = vmatpush.bf16.msrb.mxu1 %v897_v37  ;;  %583 = vmatpush.bf16.msrb.mxu0 %v921_v38 }
  0x27   :  { %932 = vmatpush.bf16.msrb.mxu2 %v921_v38 }
  0x2a   :  { %497 = vmatpush.bf16.msrb.mxu1 %v896_v40  ;;  %584 = vmatpush.bf16.msrb.mxu0 %v920_v41 }
  0x2b   :  { %933 = vmatpush.bf16.msrb.mxu2 %v920_v41 }
  0x2e   :  { %498 = vmatpush.bf16.msrb.mxu1 %v895_v42  ;;  %585 = vmatpush.bf16.msrb.mxu0 %v919_v43 }
  0x2f   :  { %934 = vmatpush.bf16.msrb.mxu2 %v919_v43 }
  0x31   :  { %489 = vmatmul.bf16.gmra.mxu1 %v686_v52  ;;  %479 = vmatmul.bf16.gmra.mxu0 %v646_v53 }
  0x32   :  { %499 = vmatpush.bf16.msrb.mxu1 %v894_v48  ;;  %586 = vmatpush.bf16.msrb.mxu0 %v918_v51  ;;  %v1207_v48 = vld [vmem:[%s1244_s2] ss:$0 sm:$0xff] }
  0x33   :  { %935 = vmatpush.bf16.msrb.mxu2 %v918_v51  ;;  %566 = vmatmul.bf16.gmra.mxu3 %v658_v59 }
  0x34   :  { %537 = vmatmul.bf16.gmra.mxu2 %v654_v54 }
  0x36   :  { %500 = vmatpush.bf16.msrb.mxu1 %v893_v57  ;;  %587 = vmatpush.bf16.msrb.mxu0 %v917_v58 }
  0x37   :  { %936 = vmatpush.bf16.msrb.mxu2 %v917_v58 }
  0x3a   :  { %501 = vmatpush.bf16.msrb.mxu1 %v892_v60  ;;  %588 = vmatpush.bf16.msrb.mxu0 %v916_v61 }
  0x3b   :  { %937 = vmatpush.bf16.msrb.mxu2 %v916_v61 }
  0x3e   :  { %502 = vmatpush.bf16.msrb.mxu1 %v891_v62  ;;  %589 = vmatpush.bf16.msrb.mxu0 %v915_v63 }
  0x3f   :  { %938 = vmatpush.bf16.msrb.mxu2 %v915_v63 }
  0x41   :  { %503 = vmatmul.bf16.vlgmr.msrb.gmra.mxu1 %v630_v6  ;;  %590 = vmatmul.bf16.vlgmr.msrb.gmra.mxu0 %v642_v7 }
  0x43   :  { %571 = vmatmul.bf16.gmra.mxu3 %v678_v11 }
  0x44   :  { %542 = vmatmul.bf16.gmra.mxu2 %v674_v8 }
  0x51   :  { %508 = vmatmul.bf16.gmra.mxu1 %v650_v18  ;;  %595 = vmatmul.bf16.gmra.mxu0 %v662_v19 }
  0x53   :  { %576 = vmatmul.bf16.gmra.mxu3 %v698_v23 }
  0x54   :  { %547 = vmatmul.bf16.gmra.mxu2 %v694_v20 }
  0x61   :  { %513 = vmatmul.bf16.gmra.mxu1 %v670_v30  ;;  %600 = vmatmul.bf16.gmra.mxu0 %v682_v31 }
  0x64   :  { %605 = vmatmul.bf16.vlgmr.msrb.gmra.mxu2 %v702_v32 }
  0x71   :  { %518 = vmatmul.bf16.gmra.mxu1 %v690_v35 }
  0x9e   :  { %v485_v36 = vpop.f32.mrf.mxu1  ;;  %v475_v37 = vpop.f32.mrf.mxu0 }
  0x9f   :  { %v476_v49 = vadd.f32 %v1207_v48, %v475_v37  ;;  %v486_v19 = vadd.f32 %v1207_v48, %v485_v36 }
  0xa6   :  { %v487_v39 = vpop.f32.mrf.mxu1  ;;  %v477_v40 = vpop.f32.mrf.mxu0 }
  0xa7   :  { %v533_v38 = vpop.f32.mrf.mxu2  ;;  %v562_v44 = vpop.f32.mrf.mxu3  ;;  %v478_v57 = vadd.f32 %v1207_v48, %v477_v40  ;;  %v488_v27 = vadd.f32 %v1207_v48, %v487_v39 }
  0xae   :  { %v1200_v42 = vpop.f32.mrf.mxu1  ;;  %v480_v43 = vpop.f32.mrf.mxu0 }
  0xaf   :  { %v535_v41 = vpop.f32.mrf.mxu2  ;;  %v564_v50 = vpop.f32.mrf.mxu3  ;;  %v481_v2 = vadd.f32 %v1207_v48, %v480_v43  ;;  %v491_v36 = vadd.f32 %v1207_v48, %v1200_v42 }
  0xb6   :  { %v1202_v46 = vpop.f32.mrf.mxu1  ;;  %v482_v47 = vpop.f32.mrf.mxu0 }
  0xb7   :  { %v538_v45 = vpop.f32.mrf.mxu2  ;;  %v567_v62 = vpop.f32.mrf.mxu3  ;;  %v483_v11 = vadd.f32 %v1207_v48, %v482_v47 }
  0xbe   :  { %v504_v51 = vpop.f32.mrf.mxu1  ;;  %v591_v52 = vpop.f32.mrf.mxu0 }
  0xbf   :  { %v505_v53 = vadd.f32 %v504_v51, %v476_v49  ;;  %v540_v54 = vpop.f32.mrf.mxu2  ;;  %v569_v8 = vpop.f32.mrf.mxu3 }
  0xc1   :  { %v534_v55 = vadd.f32 %v533_v38, %v505_v53 }
  0xc3   :  { %v563_v56 = vadd.f32 %v562_v44, %v534_v55 }
  0xc5   :  { %v592_v58 = vadd.f32 %v591_v52, %v563_v56 }
  0xc6   :  { %v506_v59 = vpop.f32.mrf.mxu1  ;;  %v593_v60 = vpop.f32.mrf.mxu0 }
  0xc7   :  { %611 = vst [vmem:[%s1246_s3] sm:$0xff] %v592_v58  ;;  %v507_v61 = vadd.f32 %v506_v59, %v478_v57  ;;  %v543_v0 = vpop.f32.mrf.mxu2  ;;  %v572_v18 = vpop.f32.mrf.mxu3 }
  0xc9   :  { %v536_v63 = vadd.f32 %v535_v41, %v507_v61 }
  0xcb   :  { %v565_v1 = vadd.f32 %v564_v50, %v536_v63 }
  0xcd   :  { %v594_v3 = vadd.f32 %v593_v60, %v565_v1 }
  0xce   :  { %v509_v4 = vpop.f32.mrf.mxu1  ;;  %v596_v5 = vpop.f32.mrf.mxu0 }
  0xcf   :  { %612 = vst [vmem:[%s1246_s3 + $0x8] sm:$0xff] %v594_v3  ;;  %v510_v6 = vadd.f32 %v509_v4, %v481_v2  ;;  %v545_v10 = vpop.f32.mrf.mxu2  ;;  %v574_v29 = vpop.f32.mrf.mxu3 }
  0xd1   :  { %v539_v7 = vadd.f32 %v538_v45, %v510_v6  ;;  %v493_v45 = vadd.f32 %v1207_v48, %v1202_v46 }
  0xd3   :  { %v568_v9 = vadd.f32 %v567_v62, %v539_v7 }
  0xd5   :  { %v597_v12 = vadd.f32 %v596_v5, %v568_v9 }
  0xd6   :  { %v511_v13 = vpop.f32.mrf.mxu1  ;;  %v598_v14 = vpop.f32.mrf.mxu0 }
  0xd7   :  { %613 = vst [vmem:[%s1246_s3 + $0x10] sm:$0xff] %v597_v12  ;;  %v512_v15 = vadd.f32 %v511_v13, %v483_v11  ;;  %v548_v21 = vpop.f32.mrf.mxu2  ;;  %v577_v40 = vpop.f32.mrf.mxu3 }
  0xd9   :  { %v541_v16 = vadd.f32 %v540_v54, %v512_v15 }
  0xdb   :  { %v570_v17 = vadd.f32 %v569_v8, %v541_v16 }
  0xdd   :  { %v599_v20 = vadd.f32 %v598_v14, %v570_v17 }
  0xde   :  { %v514_v22 = vpop.f32.mrf.mxu1  ;;  %v601_v24 = vpop.f32.mrf.mxu0 }
  0xdf   :  { %614 = vst [vmem:[%s1246_s3 + $0x18] sm:$0xff] %v599_v20  ;;  %v515_v23 = vadd.f32 %v514_v22, %v486_v19  ;;  %v550_v32 = vpop.f32.mrf.mxu2  ;;  %v579_v51 = vpop.f32.mrf.mxu3 }
  0xe1   :  { %v544_v25 = vadd.f32 %v543_v0, %v515_v23 }
  0xe3   :  { %v573_v26 = vadd.f32 %v572_v18, %v544_v25 }
  0xe5   :  { %v602_v28 = vadd.f32 %v601_v24, %v573_v26 }
  0xe6   :  { %v516_v30 = vpop.f32.mrf.mxu1  ;;  %v603_v34 = vpop.f32.mrf.mxu0 }
  0xe7   :  { %615 = vst [vmem:[%s1246_s3 + $0x20] sm:$0xff] %v602_v28  ;;  %v517_v31 = vadd.f32 %v516_v30, %v488_v27  ;;  %v606_v43 = vpop.f32.mrf.mxu2 }
  0xe9   :  { %v546_v33 = vadd.f32 %v545_v10, %v517_v31 }
  0xeb   :  { %v575_v35 = vadd.f32 %v574_v29, %v546_v33 }
  0xed   :  { %v604_v37 = vadd.f32 %v603_v34, %v575_v35 }
  0xee   :  { %v519_v38 = vpop.f32.mrf.mxu1 }
  0xef   :  { %616 = vst [vmem:[%s1246_s3 + $0x28] sm:$0xff] %v604_v37  ;;  %v520_v39 = vadd.f32 %v519_v38, %v491_v36  ;;  %v608_v53 = vpop.f32.mrf.mxu2 }
  0xf1   :  { %v549_v41 = vadd.f32 %v548_v21, %v520_v39 }
  0xf3   :  { %v578_v44 = vadd.f32 %v577_v40, %v549_v41 }
  0xf5   :  { %v607_v47 = vadd.f32 %v606_v43, %v578_v44 }
  0xf6   :  { %v521_v49 = vpop.f32.mrf.mxu1 }
  0xf7   :  { %617 = vst [vmem:[%s1246_s3 + $0x30] sm:$0xff] %v607_v47  ;;  %v522_v42 = vadd.f32 %v521_v49, %v493_v45 }
  0xf9   :  { %v551_v50 = vadd.f32 %v550_v32, %v522_v42 }
  0xfb   :  { %v580_v52 = vadd.f32 %v579_v51, %v551_v50 }
  0xfd   :  { %v609_v54 = vadd.f32 %v608_v53, %v580_v52 }
  0xff   :  { %618 = vst [vmem:[%s1246_s3 + $0x38] sm:$0xff] %v609_v54 }

// kernel: encoder_forward.9
= control target key start
LH: loop header
LB: loop body
LE: loop exit
PB: predicated region body
PF: predicated region fallthrough
CT: control target
= control target key end

     0   :  { %s523_s0 = inlined_call_operand.vmem [shape: bf16[64,128], index: 0, kind: input, shape index: {}]   ;;  %s524_s1 = inlined_call_operand.vmem [shape: bf16[128,256], index: 1, kind: input, shape index: {}]   ;;  %s525_s2 = inlined_call_operand.vmem [shape: f32[1,256], index: 2, kind: input, shape index: {}]   ;;  %s526_s3 = inlined_call_operand.hbm [shape: f32[64,256], index: 3, kind: output, shape index: {}]  }
   0x1   :  { %v315_v0 = vld [vmem:[%s524_s1 + $0x70] sm:$0xf]  ;;  %v340_v1 = vld [vmem:[%s524_s1 + $0x74] sm:$0xf0]  ;;  %v339_v2 = vld [vmem:[%s524_s1 + $0x74] sm:$0xf] }
   0x2   :  { %v316_v3 = vor.u32 %v340_v1, %v315_v0  ;;  %v317_v4 = vld [vmem:[%s524_s1 + $0x78] sm:$0xf0]  ;;  %v307_v5 = vld [vmem:[%s524_s1 + $0x60] sm:$0xf]  ;;  %v338_v6 = vld [vmem:[%s524_s1 + $0x64] sm:$0xf0] }
   0x3   :  { %v320_v7 = vor.u32 %v339_v2, %v317_v4  ;;  %v337_v8 = vld [vmem:[%s524_s1 + $0x64] sm:$0xf]  ;;  %v309_v9 = vld [vmem:[%s524_s1 + $0x68] sm:$0xf0]  ;;  %v308_v10 = vor.u32 %v338_v6, %v307_v5  ;;  %v299_v12 = vld [vmem:[%s524_s1 + $0x50] sm:$0xf] }
   0x4   :  { %149 = vmatpush.bf16.msra.mxu0 %v316_v3  ;;  %341 = vmatpush.bf16.msra.mxu2 %v316_v3  ;;  %v312_v11 = vor.u32 %v337_v8, %v309_v9  ;;  %v336_v13 = vld [vmem:[%s524_s1 + $0x54] sm:$0xf0]  ;;  %v335_v14 = vld [vmem:[%s524_s1 + $0x54] sm:$0xf]  ;;  %v301_v15 = vld [vmem:[%s524_s1 + $0x58] sm:$0xf0] }
   0x5   :  { %178 = vmatpush.bf16.msra.mxu1 %v320_v7  ;;  %349 = vmatpush.bf16.msra.mxu3 %v320_v7  ;;  %v300_v16 = vor.u32 %v336_v13, %v299_v12  ;;  %v304_v17 = vor.u32 %v335_v14, %v301_v15  ;;  %v291_v18 = vld [vmem:[%s524_s1 + $0x40] sm:$0xf]  ;;  %v334_v19 = vld [vmem:[%s524_s1 + $0x44] sm:$0xf0]  ;;  %v333_v20 = vld [vmem:[%s524_s1 + $0x44] sm:$0xf] }
   0x6   :  { %v293_v21 = vld [vmem:[%s524_s1 + $0x48] sm:$0xf0]  ;;  %v292_v22 = vor.u32 %v334_v19, %v291_v18 }
   0x8   :  { %150 = vmatpush.bf16.msra.mxu0 %v308_v10  ;;  %342 = vmatpush.bf16.msra.mxu2 %v308_v10 }
   0x9   :  { %179 = vmatpush.bf16.msra.mxu1 %v312_v11  ;;  %350 = vmatpush.bf16.msra.mxu3 %v312_v11 }
   0xc   :  { %151 = vmatpush.bf16.msra.mxu0 %v300_v16  ;;  %343 = vmatpush.bf16.msra.mxu2 %v300_v16 }
   0xd   :  { %8 = vsyncpa [#allocation3], 0  ;;  %180 = vmatpush.bf16.msra.mxu1 %v304_v17  ;;  %351 = vmatpush.bf16.msra.mxu3 %v304_v17  ;;  %v296_v23 = vor.u32 %v333_v20, %v293_v21  ;;  %v283_v24 = vld [vmem:[%s524_s1 + $0x30] sm:$0xf]  ;;  %v332_v25 = vld [vmem:[%s524_s1 + $0x34] sm:$0xf0] }
   0xe   :  { %v331_v26 = vld [vmem:[%s524_s1 + $0x34] sm:$0xf]  ;;  %v285_v27 = vld [vmem:[%s524_s1 + $0x38] sm:$0xf0]  ;;  %v284_v28 = vor.u32 %v332_v25, %v283_v24  ;;  %v275_v30 = vld [vmem:[%s524_s1 + $0x20] sm:$0xf] }
   0xf   :  { %v288_v29 = vor.u32 %v331_v26, %v285_v27  ;;  %v330_v31 = vld [vmem:[%s524_s1 + $0x24] sm:$0xf0]  ;;  %v329_v32 = vld [vmem:[%s524_s1 + $0x24] sm:$0xf]  ;;  %v277_v33 = vld [vmem:[%s524_s1 + $0x28] sm:$0xf0] }
  0x10   :  { %152 = vmatpush.bf16.msra.mxu0 %v292_v22  ;;  %344 = vmatpush.bf16.msra.mxu2 %v292_v22  ;;  %v276_v34 = vor.u32 %v330_v31, %v275_v30  ;;  %v280_v35 = vor.u32 %v329_v32, %v277_v33  ;;  %v267_v36 = vld [vmem:[%s524_s1 + $0x10] sm:$0xf]  ;;  %v328_v37 = vld [vmem:[%s524_s1 + $0x14] sm:$0xf0]  ;;  %v327_v38 = vld [vmem:[%s524_s1 + $0x14] sm:$0xf] }
  0x11   :  { %181 = vmatpush.bf16.msra.mxu1 %v296_v23  ;;  %352 = vmatpush.bf16.msra.mxu3 %v296_v23  ;;  %v269_v39 = vld [vmem:[%s524_s1 + $0x18] sm:$0xf0]  ;;  %v268_v40 = vor.u32 %v328_v37, %v267_v36  ;;  %v259_v42 = vld [vmem:[%s524_s1] sm:$0xf]  ;;  %v326_v43 = vld [vmem:[%s524_s1 + $0x4] sm:$0xf0] }
  0x12   :  { %v272_v41 = vor.u32 %v327_v38, %v269_v39  ;;  %v325_v44 = vld [vmem:[%s524_s1 + $0x4] sm:$0xf]  ;;  %v261_v45 = vld [vmem:[%s524_s1 + $0x8] sm:$0xf0]  ;;  %v260_v46 = vor.u32 %v326_v43, %v259_v42  ;;  %v323_v49 = vld [vmem:[%s523_s0 + $0x10] sm:$0xff]  ;;  %s229_s6 = sshll.u32 %s526_s3, 4  ;;  %s230_s6 = int_to_ptr.hbm [resolvable:$true] %s229_s6 }
  0x13   :  { %v264_v47 = vor.u32 %v325_v44, %v261_v45  ;;  %v321_v48 = vld [vmem:[%s523_s0] sm:$0xff]  ;;  %v322_v50 = vld [vmem:[%s523_s0 + $0x8] sm:$0xff]  ;;  %v324_v51 = vld [vmem:[%s523_s0 + $0x18] sm:$0xff]  ;;  %s386_s0 = smov [#allocation2]   ;;  %s387_s7 = smov 256  }
  0x14   :  { %153 = vmatpush.bf16.msra.mxu0 %v284_v28  ;;  %345 = vmatpush.bf16.msra.mxu2 %v284_v28  ;;  %v39_v52 = vld [vmem:[%s525_s2] sm:$0x3]  ;;  %s227_s2 = sshll.u32 %s386_s0, 4  ;;  %s388_s8 = smov 16   ;;  %s228_s2 = int_to_ptr.vmem [resolvable:$true] %s227_s2 }
  0x15   :  { %182 = vmatpush.bf16.msra.mxu1 %v288_v29  ;;  %353 = vmatpush.bf16.msra.mxu3 %v288_v29  ;;  %v41_v53 = vperm.slane %v39_v52, 0  ;;  %v42_v54 = vperm.slane %v39_v52, 1 }
  0x18   :  { %154 = vmatpush.bf16.msra.mxu0 %v276_v34  ;;  %346 = vmatpush.bf16.msra.mxu2 %v276_v34 }
  0x19   :  { %183 = vmatpush.bf16.msra.mxu1 %v280_v35  ;;  %354 = vmatpush.bf16.msra.mxu3 %v280_v35 }
  0x1c   :  { %155 = vmatpush.bf16.msra.mxu0 %v268_v40  ;;  %347 = vmatpush.bf16.msra.mxu2 %v268_v40 }
  0x1d   :  { %184 = vmatpush.bf16.msra.mxu1 %v272_v41  ;;  %355 = vmatpush.bf16.msra.mxu3 %v272_v41 }
  0x20   :  { %156 = vmatpush.bf16.msra.mxu0 %v260_v46  ;;  %348 = vmatpush.bf16.msra.mxu2 %v260_v46 }
  0x21   :  { %185 = vmatpush.bf16.msra.mxu1 %v264_v47  ;;  %356 = vmatpush.bf16.msra.mxu3 %v264_v47 }
  0x23   :  { %157 = vmatmul.bf16.vlgmr.msra.gmra.mxu0 %v321_v48  ;;  %167 = vmatmul.bf16.vlgmr.msra.gmra.mxu2 %v323_v49 }
  0x24   :  { %186 = vmatmul.bf16.vlgmr.msra.gmra.mxu1 %v321_v48  ;;  %196 = vmatmul.bf16.vlgmr.msra.gmra.mxu3 %v323_v49 }
  0x33   :  { %162 = vmatmul.bf16.gmra.mxu0 %v322_v50  ;;  %172 = vmatmul.bf16.gmra.mxu2 %v324_v51 }
  0x34   :  { %191 = vmatmul.bf16.gmra.mxu1 %v322_v50  ;;  %201 = vmatmul.bf16.gmra.mxu3 %v324_v51 }
  0xa0   :  { %v158_v55 = vpop.f32.mrf.mxu0 }
  0xa1   :  { %v159_v56 = vadd.f32 %v158_v55, %v41_v53  ;;  %v187_v57 = vpop.f32.mrf.mxu1 }
  0xa2   :  { %v188_v58 = vadd.f32 %v187_v57, %v42_v54 }
  0xa3   :  { %207 = vst [vmem:[#allocation2] sm:$0xff] %v159_v56 }
  0xa4   :  { %208 = vst [vmem:[#allocation2 + $0x8] sm:$0xff] %v188_v58 }
  0xa6   :  { %v168_v59 = vpop.f32.mrf.mxu2 }
  0xa7   :  { %v169_v60 = vadd.f32 %v168_v59, %v41_v53  ;;  %v197_v61 = vpop.f32.mrf.mxu3 }
  0xa8   :  { %v198_v62 = vadd.f32 %v197_v61, %v42_v54  ;;  %v160_v63 = vpop.f32.mrf.mxu0 }
  0xa9   :  { %215 = vst [vmem:[#allocation2 + $0x40] sm:$0xff] %v169_v60  ;;  %v161_v0 = vadd.f32 %v160_v63, %v41_v53  ;;  %v189_v1 = vpop.f32.mrf.mxu1 }
  0xaa   :  { %216 = vst [vmem:[#allocation2 + $0x48] sm:$0xff] %v198_v62  ;;  %v190_v2 = vadd.f32 %v189_v1, %v42_v54 }
  0xab   :  { %209 = vst [vmem:[#allocation2 + $0x10] sm:$0xff] %v161_v0 }
  0xac   :  { %210 = vst [vmem:[#allocation2 + $0x18] sm:$0xff] %v190_v2 }
  0xae   :  { %v170_v3 = vpop.f32.mrf.mxu2 }
  0xaf   :  { %v171_v4 = vadd.f32 %v170_v3, %v41_v53  ;;  %v199_v5 = vpop.f32.mrf.mxu3 }
  0xb0   :  { %v200_v6 = vadd.f32 %v199_v5, %v42_v54  ;;  %v163_v7 = vpop.f32.mrf.mxu0 }
  0xb1   :  { %217 = vst [vmem:[#allocation2 + $0x50] sm:$0xff] %v171_v4  ;;  %v164_v8 = vadd.f32 %v163_v7, %v41_v53  ;;  %v192_v9 = vpop.f32.mrf.mxu1 }
  0xb2   :  { %218 = vst [vmem:[#allocation2 + $0x58] sm:$0xff] %v200_v6  ;;  %v193_v10 = vadd.f32 %v192_v9, %v42_v54 }
  0xb3   :  { %211 = vst [vmem:[#allocation2 + $0x20] sm:$0xff] %v164_v8 }
  0xb4   :  { %212 = vst [vmem:[#allocation2 + $0x28] sm:$0xff] %v193_v10 }
  0xb6   :  { %v173_v11 = vpop.f32.mrf.mxu2 }
  0xb7   :  { %v174_v12 = vadd.f32 %v173_v11, %v41_v53  ;;  %v202_v13 = vpop.f32.mrf.mxu3 }
  0xb8   :  { %v203_v14 = vadd.f32 %v202_v13, %v42_v54  ;;  %v165_v15 = vpop.f32.mrf.mxu0 }
  0xb9   :  { %219 = vst [vmem:[#allocation2 + $0x60] sm:$0xff] %v174_v12  ;;  %v166_v16 = vadd.f32 %v165_v15, %v41_v53  ;;  %v194_v17 = vpop.f32.mrf.mxu1 }
  0xba   :  { %220 = vst [vmem:[#allocation2 + $0x68] sm:$0xff] %v203_v14  ;;  %v195_v18 = vadd.f32 %v194_v17, %v42_v54 }
  0xbb   :  { %213 = vst [vmem:[#allocation2 + $0x30] sm:$0xff] %v166_v16 }
  0xbc   :  { %214 = vst [vmem:[#allocation2 + $0x38] sm:$0xff] %v195_v18 }
  0xbe   :  { %v175_v19 = vpop.f32.mrf.mxu2 }
  0xbf   :  { %v176_v20 = vadd.f32 %v175_v19, %v41_v53  ;;  %v204_v21 = vpop.f32.mrf.mxu3 }
  0xc0   :  { %v205_v22 = vadd.f32 %v204_v21, %v42_v54 }
  0xc1   :  { %221 = vst [vmem:[#allocation2 + $0x70] sm:$0xff] %v176_v20 }
  0xc2   :  { %222 = vst [vmem:[#allocation2 + $0x78] sm:$0xff] %v205_v22 }
  0xc3   :  { %235 = dma.vmem_to_hbm [thread:$0]  %s228_s2, 2048, %s230_s6, [#allocation3], %s387_s7, %s387_s7, %s388_s8  }
  0xc4   :  { %384 = dma.done.wait [#allocation3], 2048  }
  0xc5   :  { %385 = vsyncadd [#allocation3], 4294965248 }
  0xc6   :  { %240 = vsyncpa [#allocation3], 1 }

// kernel: encoder_forward.7
= control target key start
LH: loop header
LB: loop body
LE: loop exit
PB: predicated region body
PF: predicated region fallthrough
CT: control target
= control target key end

     0   :  { %s1764_s1 = inlined_call_operand.vmem [shape: bf16[896,128], index: 1, kind: input, shape index: {}]   ;;  %s1765_s2 = inlined_call_operand.vmem [shape: f32[1,128], index: 2, kind: input, shape index: {}]   ;;  %s1766_s0 = inlined_call_operand.vmem [shape: bf16[64,896], index: 0, kind: input, shape index: {}]   ;;  %s1767_s3 = inlined_call_operand.vmem [shape: f32[64,128], index: 3, kind: output, shape index: {}]  }
   0x1   :  { %v1228_v0 = vld [vmem:[%s1764_s1 + $0x38] sm:$0xff]  ;;  %v1227_v3 = vld [vmem:[%s1764_s1 + $0x30] sm:$0xff]  ;;  %v1226_v6 = vld [vmem:[%s1764_s1 + $0x28] sm:$0xff] }
   0x2   :  { %v1236_v1 = vld [vmem:[%s1764_s1 + $0x78] sm:$0xff]  ;;  %642 = vmatpush.bf16.msra.mxu0 %v1228_v0  ;;  %1277 = vmatpush.bf16.msra.mxu3 %v1228_v0  ;;  %v1235_v4 = vld [vmem:[%s1764_s1 + $0x70] sm:$0xff]  ;;  %v1234_v7 = vld [vmem:[%s1764_s1 + $0x68] sm:$0xff] }
   0x3   :  { %v1244_v2 = vld [vmem:[%s1764_s1 + $0xb8] sm:$0xff]  ;;  %671 = vmatpush.bf16.msra.mxu1 %v1236_v1  ;;  %v1243_v5 = vld [vmem:[%s1764_s1 + $0xb0] sm:$0xff]  ;;  %v1242_v8 = vld [vmem:[%s1764_s1 + $0xa8] sm:$0xff] }
   0x4   :  { %700 = vmatpush.bf16.msra.mxu2 %v1244_v2  ;;  %v1225_v9 = vld [vmem:[%s1764_s1 + $0x20] sm:$0xff]  ;;  %v1224_v12 = vld [vmem:[%s1764_s1 + $0x18] sm:$0xff]  ;;  %v1223_v15 = vld [vmem:[%s1764_s1 + $0x10] sm:$0xff] }
   0x5   :  { %v1233_v10 = vld [vmem:[%s1764_s1 + $0x60] sm:$0xff]  ;;  %v1232_v13 = vld [vmem:[%s1764_s1 + $0x58] sm:$0xff]  ;;  %v1231_v16 = vld [vmem:[%s1764_s1 + $0x50] sm:$0xff] }
   0x6   :  { %643 = vmatpush.bf16.msra.mxu0 %v1227_v3  ;;  %1278 = vmatpush.bf16.msra.mxu3 %v1227_v3  ;;  %v1241_v11 = vld [vmem:[%s1764_s1 + $0xa0] sm:$0xff]  ;;  %v1240_v14 = vld [vmem:[%s1764_s1 + $0x98] sm:$0xff]  ;;  %v1239_v17 = vld [vmem:[%s1764_s1 + $0x90] sm:$0xff] }
   0x7   :  { %672 = vmatpush.bf16.msra.mxu1 %v1235_v4  ;;  %v1222_v18 = vld [vmem:[%s1764_s1 + $0x8] sm:$0xff]  ;;  %v1221_v21 = vld [vmem:[%s1764_s1] sm:$0xff]  ;;  %v1196_v25 = vld [vmem:[%s1766_s0 + $0x18] sm:$0xf0] }
   0x8   :  { %701 = vmatpush.bf16.msra.mxu2 %v1243_v5  ;;  %v1230_v19 = vld [vmem:[%s1764_s1 + $0x48] sm:$0xff]  ;;  %v1229_v22 = vld [vmem:[%s1764_s1 + $0x40] sm:$0xff]  ;;  %v915_v26 = vld [vmem:[%s1766_s0 + $0x70] sm:$0xf] }
   0x9   :  { %v1238_v20 = vld [vmem:[%s1764_s1 + $0x88] sm:$0xff]  ;;  %v1237_v23 = vld [vmem:[%s1764_s1 + $0x80] sm:$0xff]  ;;  %v1252_v32 = vld [vmem:[%s1764_s1 + $0xf8] sm:$0xff] }
   0xa   :  { %644 = vmatpush.bf16.msra.mxu0 %v1226_v6  ;;  %1279 = vmatpush.bf16.msra.mxu3 %v1226_v6  ;;  %v859_v24 = vld [vmem:[%s1766_s0] sm:$0xf]  ;;  %v1210_v27 = vld [vmem:[%s1766_s0 + $0x88] sm:$0xf0]  ;;  %v1193_v28 = vld [vmem:[%s1766_s0 + $0x4] sm:$0xf] }
   0xb   :  { %673 = vmatpush.bf16.msra.mxu1 %v1234_v7  ;;  %v861_v29 = vld [vmem:[%s1766_s0 + $0x1c] sm:$0xf0]  ;;  %v867_v30 = vld [vmem:[%s1766_s0 + $0x8] sm:$0xf]  ;;  %v1197_v31 = vld [vmem:[%s1766_s0 + $0x20] sm:$0xf0]  ;;  %v860_v34 = vor.u32 %v1196_v25, %v859_v24  ;;  %v916_v35 = vor.u32 %v1210_v27, %v915_v26 }
   0xc   :  { %702 = vmatpush.bf16.msra.mxu2 %v1242_v8  ;;  %v1424_v33 = vld [vmem:[%s1764_s1 + $0x1b8] sm:$0xff]  ;;  %v864_v36 = vor.u32 %v1193_v28, %v861_v29  ;;  %v868_v37 = vor.u32 %v1197_v31, %v867_v30  ;;  %v1251_v40 = vld [vmem:[%s1764_s1 + $0xf0] sm:$0xff]  ;;  %v1250_v44 = vld [vmem:[%s1764_s1 + $0xe8] sm:$0xff] }
   0xd   :  { %v1260_v38 = vld [vmem:[%s1764_s1 + $0x138] sm:$0xff]  ;;  %v1441_v41 = vld [vmem:[%s1764_s1 + $0x1b0] sm:$0xff]  ;;  %v1459_v45 = vld [vmem:[%s1764_s1 + $0x1a8] sm:$0xff] }
   0xe   :  { %645 = vmatpush.bf16.msra.mxu0 %v1225_v9  ;;  %1280 = vmatpush.bf16.msra.mxu3 %v1225_v9  ;;  %v1432_v39 = vld [vmem:[%s1764_s1 + $0x178] sm:$0xff]  ;;  %v1259_v42 = vld [vmem:[%s1764_s1 + $0x130] sm:$0xff]  ;;  %v1258_v46 = vld [vmem:[%s1764_s1 + $0x128] sm:$0xff] }
   0xf   :  { %674 = vmatpush.bf16.msra.mxu1 %v1233_v10  ;;  %v1450_v43 = vld [vmem:[%s1764_s1 + $0x170] sm:$0xff]  ;;  %v1468_v47 = vld [vmem:[%s1764_s1 + $0x168] sm:$0xff]  ;;  %v1249_v48 = vld [vmem:[%s1764_s1 + $0xe0] sm:$0xff] }
  0x10   :  { %703 = vmatpush.bf16.msra.mxu2 %v1241_v11  ;;  %v1477_v49 = vld [vmem:[%s1764_s1 + $0x1a0] sm:$0xff]  ;;  %v887_v51 = vld [vmem:[%s1766_s0 + $0x38] sm:$0xf]  ;;  %v1203_v52 = vld [vmem:[%s1766_s0 + $0x50] sm:$0xf0] }
  0x11   :  { %v1257_v50 = vld [vmem:[%s1764_s1 + $0x120] sm:$0xff]  ;;  %v943_v53 = vld [vmem:[%s1766_s0 + $0xa8] sm:$0xf]  ;;  %v1200_v55 = vld [vmem:[%s1766_s0 + $0x3c] sm:$0xf]  ;;  %v888_v62 = vor.u32 %v1203_v52, %v887_v51 }
  0x12   :  { %646 = vmatpush.bf16.msra.mxu0 %v1224_v12  ;;  %1281 = vmatpush.bf16.msra.mxu3 %v1224_v12  ;;  %v1217_v54 = vld [vmem:[%s1766_s0 + $0xc0] sm:$0xf0]  ;;  %v889_v56 = vld [vmem:[%s1766_s0 + $0x54] sm:$0xf0]  ;;  %v895_v57 = vld [vmem:[%s1766_s0 + $0x40] sm:$0xf] }
  0x13   :  { %675 = vmatpush.bf16.msra.mxu1 %v1232_v13  ;;  %v1204_v58 = vld [vmem:[%s1766_s0 + $0x58] sm:$0xf0]  ;;  %v1510_v59 = vld [vmem:[%s1764_s1 + $0x160] sm:$0xff]  ;;  %v944_v63 = vor.u32 %v1217_v54, %v943_v53  ;;  %v892_v0 = vor.u32 %v1200_v55, %v889_v56  ;;  %v1247_v4 = vld [vmem:[%s1764_s1 + $0xd0] sm:$0xff] }
  0x14   :  { %704 = vmatpush.bf16.msra.mxu2 %v1240_v14  ;;  %v1248_v60 = vld [vmem:[%s1764_s1 + $0xd8] sm:$0xff]  ;;  %v896_v1 = vor.u32 %v1204_v58, %v895_v57  ;;  %v1537_v5 = vld [vmem:[%s1764_s1 + $0x190] sm:$0xff]  ;;  %v1246_v8 = vld [vmem:[%s1764_s1 + $0xc8] sm:$0xff] }
  0x15   :  { %v1519_v61 = vld [vmem:[%s1764_s1 + $0x198] sm:$0xff]  ;;  %v1255_v6 = vld [vmem:[%s1764_s1 + $0x110] sm:$0xff]  ;;  %v1270_v9 = vld [vmem:[%s1764_s1 + $0x188] sm:$0xff] }
  0x16   :  { %647 = vmatpush.bf16.msra.mxu0 %v1223_v15  ;;  %1282 = vmatpush.bf16.msra.mxu3 %v1223_v15  ;;  %v1256_v2 = vld [vmem:[%s1764_s1 + $0x118] sm:$0xff]  ;;  %v1546_v7 = vld [vmem:[%s1764_s1 + $0x150] sm:$0xff]  ;;  %v1254_v10 = vld [vmem:[%s1764_s1 + $0x108] sm:$0xff] }
  0x17   :  { %676 = vmatpush.bf16.msra.mxu1 %v1231_v16  ;;  %v1528_v3 = vld [vmem:[%s1764_s1 + $0x158] sm:$0xff]  ;;  %v1262_v11 = vld [vmem:[%s1764_s1 + $0x148] sm:$0xff]  ;;  %v1245_v12 = vld [vmem:[%s1764_s1 + $0xc0] sm:$0xff] }
  0x18   :  { %705 = vmatpush.bf16.msra.mxu2 %v1239_v17  ;;  %v1269_v13 = vld [vmem:[%s1764_s1 + $0x180] sm:$0xff]  ;;  %v1207_v15 = vld [vmem:[%s1766_s0 + $0x74] sm:$0xf]  ;;  %v917_v16 = vld [vmem:[%s1766_s0 + $0x8c] sm:$0xf0] }
  0x19   :  { %v1253_v14 = vld [vmem:[%s1764_s1 + $0x100] sm:$0xff]  ;;  %v1194_v17 = vld [vmem:[%s1766_s0 + $0xc] sm:$0xf]  ;;  %v920_v25 = vor.u32 %v1207_v15, %v917_v16  ;;  %v945_v31 = vld [vmem:[%s1766_s0 + $0xc4] sm:$0xf0] }
  0x1a   :  { %648 = vmatpush.bf16.msra.mxu0 %v1222_v18  ;;  %1283 = vmatpush.bf16.msra.mxu3 %v1222_v18  ;;  %v869_v18 = vld [vmem:[%s1766_s0 + $0x24] sm:$0xf0]  ;;  %v1214_v28 = vld [vmem:[%s1766_s0 + $0xac] sm:$0xf]  ;;  %v1201_v29 = vld [vmem:[%s1766_s0 + $0x44] sm:$0xf] }
  0x1b   :  { %677 = vmatpush.bf16.msra.mxu1 %v1230_v19  ;;  %v923_v19 = vld [vmem:[%s1766_s0 + $0x78] sm:$0xf]  ;;  %v872_v24 = vor.u32 %v1194_v17, %v869_v18  ;;  %v897_v30 = vld [vmem:[%s1766_s0 + $0x5c] sm:$0xf0]  ;;  %v1215_v52 = vld [vmem:[%s1766_s0 + $0xb4] sm:$0xf] }
  0x1c   :  { %706 = vmatpush.bf16.msra.mxu2 %v1238_v20  ;;  %v1211_v20 = vld [vmem:[%s1766_s0 + $0x90] sm:$0xf0]  ;;  %v953_v53 = vld [vmem:[%s1766_s0 + $0xcc] sm:$0xf0]  ;;  %v1209_v54 = vld [vmem:[%s1766_s0 + $0x84] sm:$0xf] }
  0x1d   :  { %v924_v26 = vor.u32 %v1211_v20, %v923_v19  ;;  %v933_v55 = vld [vmem:[%s1766_s0 + $0x9c] sm:$0xf0]  ;;  %v911_v56 = vld [vmem:[%s1766_s0 + $0x50] sm:$0xf]  ;;  %v1206_v57 = vld [vmem:[%s1766_s0 + $0x68] sm:$0xf0] }
  0x1e   :  { %649 = vmatpush.bf16.msra.mxu0 %v1221_v21  ;;  %1284 = vmatpush.bf16.msra.mxu3 %v1221_v21  ;;  %v1261_v21 = vld [vmem:[%s1764_s1 + $0x140] sm:$0xff]  ;;  %v959_v58 = vld [vmem:[%s1766_s0 + $0xb8] sm:$0xf] }
  0x1f   :  { %678 = vmatpush.bf16.msra.mxu1 %v1229_v22  ;;  %v875_v22 = vld [vmem:[%s1766_s0 + $0x10] sm:$0xf] }
  0x20   :  { %707 = vmatpush.bf16.msra.mxu2 %v1237_v23  ;;  %v1198_v23 = vld [vmem:[%s1766_s0 + $0x28] sm:$0xf0] }
  0x21   :  { %650 = vmatmul.bf16.vlgmr.msra.gmra.mxu0 %v860_v34  ;;  %660 = vmatmul.bf16.vlgmr.msra.gmra.mxu3 %v916_v35  ;;  %v876_v27 = vor.u32 %v1198_v23, %v875_v22  ;;  %v903_v34 = vld [vmem:[%s1766_s0 + $0x48] sm:$0xf]  ;;  %v1205_v35 = vld [vmem:[%s1766_s0 + $0x60] sm:$0xf0] }
  0x22   :  { %729 = vmatpush.bf16.msrb.mxu3 %v1252_v32  ;;  %679 = vmatmul.bf16.vlgmr.msra.gmra.mxu1 %v864_v36  ;;  %v951_v32 = vld [vmem:[%s1766_s0 + $0xb0] sm:$0xf]  ;;  %v900_v36 = vor.u32 %v1201_v29, %v897_v30 }
  0x23   :  { %708 = vmatmul.bf16.vlgmr.msra.gmra.mxu2 %v868_v37  ;;  %758 = vmatpush.bf16.msrb.mxu0 %v1260_v38  ;;  %v948_v37 = vor.u32 %v1214_v28, %v945_v31 }
  0x24   :  { %816 = vmatpush.bf16.msrb.mxu2 %v1424_v33  ;;  %1285 = vmatpush.bf16.msrb.mxu1 %v1432_v39 }
  0x26   :  { %730 = vmatpush.bf16.msrb.mxu3 %v1251_v40  ;;  %v1208_v40 = vld [vmem:[%s1766_s0 + $0x7c] sm:$0xf] }
  0x27   :  { %759 = vmatpush.bf16.msrb.mxu0 %v1259_v42  ;;  %v1202_v42 = vld [vmem:[%s1766_s0 + $0x4c] sm:$0xf] }
  0x28   :  { %817 = vmatpush.bf16.msrb.mxu2 %v1441_v41  ;;  %1286 = vmatpush.bf16.msrb.mxu1 %v1450_v43 }
  0x2a   :  { %731 = vmatpush.bf16.msrb.mxu3 %v1250_v44  ;;  %v883_v44 = vld [vmem:[%s1766_s0 + $0x18] sm:$0xf] }
  0x2b   :  { %760 = vmatpush.bf16.msrb.mxu0 %v1258_v46  ;;  %v931_v46 = vld [vmem:[%s1766_s0 + $0x80] sm:$0xf] }
  0x2c   :  { %818 = vmatpush.bf16.msrb.mxu2 %v1459_v45  ;;  %1287 = vmatpush.bf16.msrb.mxu1 %v1468_v47 }
  0x2e   :  { %732 = vmatpush.bf16.msrb.mxu3 %v1249_v48 }
  0x2f   :  { %761 = vmatpush.bf16.msrb.mxu0 %v1257_v50 }
  0x30   :  { %819 = vmatpush.bf16.msrb.mxu2 %v1477_v49  ;;  %1288 = vmatpush.bf16.msrb.mxu1 %v1510_v59 }
  0x31   :  { %655 = vmatmul.bf16.gmra.mxu0 %v888_v62  ;;  %665 = vmatmul.bf16.gmra.mxu3 %v944_v63  ;;  %v912_v62 = vor.u32 %v1206_v57, %v911_v56 }
  0x32   :  { %733 = vmatpush.bf16.msrb.mxu3 %v1248_v60  ;;  %684 = vmatmul.bf16.gmra.mxu1 %v892_v0  ;;  %v956_v60 = vor.u32 %v1215_v52, %v953_v53  ;;  %v1216_v0 = vld [vmem:[%s1766_s0 + $0xbc] sm:$0xf] }
  0x33   :  { %713 = vmatmul.bf16.gmra.mxu2 %v896_v1  ;;  %762 = vmatpush.bf16.msrb.mxu0 %v1256_v2  ;;  %v967_v1 = vld [vmem:[%s1766_s0 + $0xc0] sm:$0xf]  ;;  %v1220_v2 = vld [vmem:[%s1766_s0 + $0xd8] sm:$0xf0] }
  0x34   :  { %820 = vmatpush.bf16.msrb.mxu2 %v1519_v61  ;;  %1289 = vmatpush.bf16.msrb.mxu1 %v1528_v3 }
  0x36   :  { %734 = vmatpush.bf16.msrb.mxu3 %v1247_v4  ;;  %v939_v4 = vld [vmem:[%s1766_s0 + $0x88] sm:$0xf] }
  0x37   :  { %763 = vmatpush.bf16.msrb.mxu0 %v1255_v6  ;;  %v1195_v6 = vld [vmem:[%s1766_s0 + $0x14] sm:$0xf] }
  0x38   :  { %821 = vmatpush.bf16.msrb.mxu2 %v1537_v5  ;;  %1290 = vmatpush.bf16.msrb.mxu1 %v1546_v7 }
  0x3a   :  { %735 = vmatpush.bf16.msrb.mxu3 %v1246_v8  ;;  %v968_v8 = vor.u32 %v1220_v2, %v967_v1 }
  0x3b   :  { %764 = vmatpush.bf16.msrb.mxu0 %v1254_v10 }
  0x3c   :  { %822 = vmatpush.bf16.msrb.mxu2 %v1270_v9  ;;  %1291 = vmatpush.bf16.msrb.mxu1 %v1262_v11 }
  0x3e   :  { %736 = vmatpush.bf16.msrb.mxu3 %v1245_v12  ;;  %v1709_v12 = vld [vmem:[%s1765_s2] ss:$0 sm:$0xff] }
  0x3f   :  { %765 = vmatpush.bf16.msrb.mxu0 %v1253_v14 }
  0x40   :  { %823 = vmatpush.bf16.msrb.mxu2 %v1269_v13  ;;  %1292 = vmatpush.bf16.msrb.mxu1 %v1261_v21 }
  0x41   :  { %737 = vmatmul.bf16.vlgmr.msrb.gmra.mxu3 %v872_v24 }
  0x42   :  { %1293 = vmatpush.bf16.msra.mxu3 %v1424_v33  ;;  %689 = vmatmul.bf16.gmra.mxu1 %v920_v25  ;;  %v1218_v33 = vld [vmem:[%s1766_s0 + $0xc8] sm:$0xf0] }
  0x43   :  { %787 = vmatpush.bf16.msra.mxu0 %v1432_v39  ;;  %718 = vmatmul.bf16.gmra.mxu2 %v924_v26  ;;  %v952_v38 = vor.u32 %v1218_v33, %v951_v32  ;;  %v904_v39 = vor.u32 %v1205_v35, %v903_v34 }
  0x44   :  { %766 = vmatmul.bf16.vlgmr.msrb.gmra.mxu0 %v876_v27 }
  0x46   :  { %1294 = vmatpush.bf16.msra.mxu3 %v1441_v41  ;;  %v925_v41 = vld [vmem:[%s1766_s0 + $0x94] sm:$0xf0] }
  0x47   :  { %788 = vmatpush.bf16.msra.mxu0 %v1450_v43  ;;  %v905_v43 = vld [vmem:[%s1766_s0 + $0x64] sm:$0xf0]  ;;  %v928_v48 = vor.u32 %v1208_v40, %v925_v41 }
  0x4a   :  { %1295 = vmatpush.bf16.msra.mxu3 %v1459_v45  ;;  %v1199_v45 = vld [vmem:[%s1766_s0 + $0x30] sm:$0xf0] }
  0x4b   :  { %789 = vmatpush.bf16.msra.mxu0 %v1468_v47  ;;  %v1212_v47 = vld [vmem:[%s1766_s0 + $0x98] sm:$0xf0]  ;;  %v884_v50 = vor.u32 %v1199_v45, %v883_v44 }
  0x4c   :  { %v932_v51 = vor.u32 %v1212_v47, %v931_v46 }
  0x4e   :  { %1296 = vmatpush.bf16.msra.mxu3 %v1477_v49  ;;  %v908_v49 = vor.u32 %v1202_v42, %v905_v43 }
  0x4f   :  { %790 = vmatpush.bf16.msra.mxu0 %v1510_v59  ;;  %v1219_v59 = vld [vmem:[%s1766_s0 + $0xd0] sm:$0xf0] }
  0x50   :  { %v960_v63 = vor.u32 %v1219_v59, %v959_v58 }
  0x51   :  { %742 = vmatmul.bf16.gmra.mxu3 %v900_v36 }
  0x52   :  { %1297 = vmatpush.bf16.msra.mxu3 %v1519_v61  ;;  %694 = vmatmul.bf16.gmra.mxu1 %v948_v37  ;;  %v936_v61 = vor.u32 %v1209_v54, %v933_v55 }
  0x53   :  { %791 = vmatpush.bf16.msra.mxu0 %v1528_v3  ;;  %723 = vmatmul.bf16.gmra.mxu2 %v952_v38  ;;  %v961_v3 = vld [vmem:[%s1766_s0 + $0xd4] sm:$0xf0] }
  0x54   :  { %771 = vmatmul.bf16.gmra.mxu0 %v904_v39 }
  0x56   :  { %1298 = vmatpush.bf16.msra.mxu3 %v1537_v5  ;;  %v1213_v5 = vld [vmem:[%s1766_s0 + $0xa0] sm:$0xf0] }
  0x57   :  { %792 = vmatpush.bf16.msra.mxu0 %v1546_v7  ;;  %v877_v7 = vld [vmem:[%s1766_s0 + $0x2c] sm:$0xf0]  ;;  %v940_v10 = vor.u32 %v1213_v5, %v939_v4 }
  0x5a   :  { %1299 = vmatpush.bf16.msra.mxu3 %v1270_v9  ;;  %v964_v9 = vor.u32 %v1216_v0, %v961_v3 }
  0x5b   :  { %793 = vmatpush.bf16.msra.mxu0 %v1262_v11  ;;  %v880_v11 = vor.u32 %v1195_v6, %v877_v7 }
  0x5e   :  { %1300 = vmatpush.bf16.msra.mxu3 %v1269_v13 }
  0x5f   :  { %794 = vmatpush.bf16.msra.mxu0 %v1261_v21 }
  0x61   :  { %747 = vmatmul.bf16.gmra.mxu3 %v928_v48 }
  0x62   :  { %800 = vmatmul.bf16.vlgmr.msrb.gmra.mxu1 %v908_v49 }
  0x63   :  { %824 = vmatmul.bf16.vlgmr.msrb.gmra.mxu2 %v884_v50 }
  0x64   :  { %776 = vmatmul.bf16.gmra.mxu0 %v932_v51 }
  0x71   :  { %752 = vmatmul.bf16.gmra.mxu3 %v956_v60 }
  0x72   :  { %805 = vmatmul.bf16.gmra.mxu1 %v936_v61 }
  0x73   :  { %829 = vmatmul.bf16.gmra.mxu2 %v912_v62 }
  0x74   :  { %781 = vmatmul.bf16.gmra.mxu0 %v960_v63 }
  0x81   :  { %839 = vmatmul.bf16.vlgmr.msra.gmra.mxu3 %v968_v8 }
  0x82   :  { %810 = vmatmul.bf16.gmra.mxu1 %v964_v9 }
  0x83   :  { %834 = vmatmul.bf16.gmra.mxu2 %v940_v10 }
  0x84   :  { %795 = vmatmul.bf16.vlgmr.msra.gmra.mxu0 %v880_v11 }
  0x9e   :  { %v651_v13 = vpop.f32.mrf.mxu0 }
  0x9f   :  { %v652_v14 = vadd.f32 %v1709_v12, %v651_v13  ;;  %v680_v15 = vpop.f32.mrf.mxu1 }
  0xa1   :  { %v681_v16 = vadd.f32 %v680_v15, %v652_v14 }
  0xa4   :  { %v661_v17 = vpop.f32.mrf.mxu3 }
  0xa5   :  { %v662_v13 = vadd.f32 %v1709_v12, %v661_v17 }
  0xa6   :  { %v709_v18 = vpop.f32.mrf.mxu2  ;;  %v653_v20 = vpop.f32.mrf.mxu0 }
  0xa7   :  { %v1712_v19 = vadd.f32 %v709_v18, %v681_v16  ;;  %v654_v21 = vadd.f32 %v1709_v12, %v653_v20  ;;  %v682_v22 = vpop.f32.mrf.mxu1 }
  0xa9   :  { %v683_v23 = vadd.f32 %v682_v22, %v654_v21 }
  0xac   :  { %v1715_v24 = vpop.f32.mrf.mxu3 }
  0xae   :  { %v711_v25 = vpop.f32.mrf.mxu2  ;;  %v656_v27 = vpop.f32.mrf.mxu0 }
  0xaf   :  { %v1717_v26 = vadd.f32 %v711_v25, %v683_v23  ;;  %v685_v28 = vpop.f32.mrf.mxu1  ;;  %v657_v53 = vadd.f32 %v1709_v12, %v656_v27 }
  0xb1   :  { %v686_v57 = vadd.f32 %v685_v28, %v657_v53 }
  0xb4   :  { %v666_v29 = vpop.f32.mrf.mxu3 }
  0xb5   :  { %v667_v10 = vadd.f32 %v1709_v12, %v666_v29 }
  0xb6   :  { %v714_v30 = vpop.f32.mrf.mxu2  ;;  %v658_v31 = vpop.f32.mrf.mxu0 }
  0xb7   :  { %v687_v32 = vpop.f32.mrf.mxu1  ;;  %v715_v59 = vadd.f32 %v714_v30, %v686_v57  ;;  %v659_v62 = vadd.f32 %v1709_v12, %v658_v31 }
  0xb9   :  { %v688_v2 = vadd.f32 %v687_v32, %v659_v62 }
  0xbc   :  { %v668_v33 = vpop.f32.mrf.mxu3 }
  0xbd   :  { %v669_v17 = vadd.f32 %v1709_v12, %v668_v33 }
  0xbe   :  { %v716_v34 = vpop.f32.mrf.mxu2 }
  0xbf   :  { %v690_v35 = vpop.f32.mrf.mxu1  ;;  %v717_v4 = vadd.f32 %v716_v34, %v688_v2  ;;  %v664_v34 = vadd.f32 %v1709_v12, %v1715_v24 }
  0xc0   :  { %v691_v16 = vadd.f32 %v690_v35, %v662_v13 }
  0xc1   :  { %v767_v36 = vpop.f32.mrf.mxu0 }
  0xc4   :  { %v738_v37 = vpop.f32.mrf.mxu3 }
  0xc5   :  { %v739_v20 = vadd.f32 %v738_v37, %v1712_v19 }
  0xc6   :  { %v719_v38 = vpop.f32.mrf.mxu2 }
  0xc7   :  { %v692_v39 = vpop.f32.mrf.mxu1  ;;  %v720_v22 = vadd.f32 %v719_v38, %v691_v16  ;;  %v768_v31 = vadd.f32 %v767_v36, %v739_v20 }
  0xc9   :  { %v1719_v40 = vpop.f32.mrf.mxu0 }
  0xcc   :  { %v740_v41 = vpop.f32.mrf.mxu3 }
  0xce   :  { %v1721_v42 = vpop.f32.mrf.mxu2 }
  0xcf   :  { %v695_v43 = vpop.f32.mrf.mxu1 }
  0xd0   :  { %v696_v15 = vadd.f32 %v695_v43, %v667_v10  ;;  %v693_v43 = vadd.f32 %v692_v39, %v664_v34 }
  0xd1   :  { %v772_v44 = vpop.f32.mrf.mxu0 }
  0xd2   :  { %v722_v36 = vadd.f32 %v1721_v42, %v693_v43 }
  0xd4   :  { %v743_v45 = vpop.f32.mrf.mxu3 }
  0xd5   :  { %v744_v63 = vadd.f32 %v743_v45, %v715_v59  ;;  %v741_v45 = vadd.f32 %v740_v41, %v1717_v26 }
  0xd6   :  { %v724_v46 = vpop.f32.mrf.mxu2 }
  0xd7   :  { %v697_v47 = vpop.f32.mrf.mxu1  ;;  %v773_v3 = vadd.f32 %v772_v44, %v744_v63  ;;  %v725_v21 = vadd.f32 %v724_v46, %v696_v15  ;;  %v770_v26 = vadd.f32 %v1719_v40, %v741_v45 }
  0xd8   :  { %v698_v35 = vadd.f32 %v697_v47, %v669_v17 }
  0xd9   :  { %v774_v48 = vpop.f32.mrf.mxu0 }
  0xdc   :  { %v745_v49 = vpop.f32.mrf.mxu3 }
  0xdd   :  { %v746_v8 = vadd.f32 %v745_v49, %v717_v4 }
  0xde   :  { %v726_v50 = vpop.f32.mrf.mxu2 }
  0xdf   :  { %v801_v51 = vpop.f32.mrf.mxu1  ;;  %v775_v18 = vadd.f32 %v774_v48, %v746_v8  ;;  %v727_v46 = vadd.f32 %v726_v50, %v698_v35 }
  0xe0   :  { %v802_v5 = vadd.f32 %v801_v51, %v773_v3 }
  0xe1   :  { %v777_v52 = vpop.f32.mrf.mxu0 }
  0xe4   :  { %v748_v54 = vpop.f32.mrf.mxu3 }
  0xe5   :  { %v749_v29 = vadd.f32 %v748_v54, %v720_v22 }
  0xe6   :  { %v825_v55 = vpop.f32.mrf.mxu2 }
  0xe7   :  { %v803_v56 = vpop.f32.mrf.mxu1  ;;  %v778_v44 = vadd.f32 %v777_v52, %v749_v29 }
  0xe8   :  { %v804_v23 = vadd.f32 %v803_v56, %v775_v18 }
  0xe9   :  { %v1724_v58 = vpop.f32.mrf.mxu0 }
  0xec   :  { %v750_v60 = vpop.f32.mrf.mxu3 }
  0xed   :  { %v751_v53 = vadd.f32 %v750_v60, %v722_v36 }
  0xee   :  { %v1726_v61 = vpop.f32.mrf.mxu2 }
  0xef   :  { %v806_v0 = vpop.f32.mrf.mxu1  ;;  %v780_v52 = vadd.f32 %v1724_v58, %v751_v53 }
  0xf0   :  { %v807_v49 = vadd.f32 %v806_v0, %v778_v44 }
  0xf1   :  { %v782_v1 = vpop.f32.mrf.mxu0 }
  0xf4   :  { %v753_v6 = vpop.f32.mrf.mxu3 }
  0xf5   :  { %v754_v27 = vadd.f32 %v753_v6, %v725_v21 }
  0xf6   :  { %v830_v7 = vpop.f32.mrf.mxu2 }
  0xf7   :  { %v831_v9 = vadd.f32 %v830_v7, %v802_v5  ;;  %v808_v11 = vpop.f32.mrf.mxu1  ;;  %v783_v38 = vadd.f32 %v782_v1, %v754_v27 }
  0xf8   :  { %v809_v57 = vadd.f32 %v808_v11, %v780_v52 }
  0xf9   :  { %847 = vst [vmem:[%s1767_s3 + $0x10] sm:$0xff] %v831_v9  ;;  %v784_v14 = vpop.f32.mrf.mxu0 }
  0xfc   :  { %v755_v25 = vpop.f32.mrf.mxu3 }
  0xfd   :  { %v756_v12 = vadd.f32 %v755_v25, %v727_v46 }
  0xfe   :  { %v832_v28 = vpop.f32.mrf.mxu2 }
  0xff   :  { %v833_v30 = vadd.f32 %v832_v28, %v804_v23  ;;  %v811_v32 = vpop.f32.mrf.mxu1  ;;  %v785_v50 = vadd.f32 %v784_v14, %v756_v12 }
 0x100   :  { %v812_v33 = vadd.f32 %v811_v32, %v783_v38 }
 0x101   :  { %848 = vst [vmem:[%s1767_s3 + $0x18] sm:$0xff] %v833_v30  ;;  %v796_v19 = vpop.f32.mrf.mxu0 }
 0x102   :  { %v797_v37 = vadd.f32 %v796_v19, %v768_v31 }
 0x104   :  { %v826_v48 = vadd.f32 %v825_v55, %v797_v37  ;;  %v840_v51 = vpop.f32.mrf.mxu3 }
 0x105   :  { %v841_v47 = vadd.f32 %v840_v51, %v812_v33 }
 0x106   :  { %845 = vst [vmem:[%s1767_s3] sm:$0xff] %v826_v48  ;;  %v835_v24 = vpop.f32.mrf.mxu2 }
 0x107   :  { %v836_v54 = vadd.f32 %v835_v24, %v807_v49  ;;  %851 = vst [vmem:[%s1767_s3 + $0x30] sm:$0xff] %v841_v47  ;;  %v813_v41 = vpop.f32.mrf.mxu1 }
 0x108   :  { %v814_v56 = vadd.f32 %v813_v41, %v785_v50 }
 0x109   :  { %849 = vst [vmem:[%s1767_s3 + $0x20] sm:$0xff] %v836_v54  ;;  %v798_v39 = vpop.f32.mrf.mxu0 }
 0x10a   :  { %v799_v42 = vadd.f32 %v798_v39, %v770_v26 }
 0x10c   :  { %v828_v55 = vadd.f32 %v1726_v61, %v799_v42  ;;  %v842_v59 = vpop.f32.mrf.mxu3 }
 0x10d   :  { %v843_v60 = vadd.f32 %v842_v59, %v814_v56 }
 0x10e   :  { %846 = vst [vmem:[%s1767_s3 + $0x8] sm:$0xff] %v828_v55  ;;  %v837_v40 = vpop.f32.mrf.mxu2 }
 0x10f   :  { %v838_v62 = vadd.f32 %v837_v40, %v809_v57  ;;  %852 = vst [vmem:[%s1767_s3 + $0x38] sm:$0xff] %v843_v60 }
 0x111   :  { %850 = vst [vmem:[%s1767_s3 + $0x28] sm:$0xff] %v838_v62 }

</bundles_post_ra>
